<compile_context>
chip_gen: v7x
topology: tpu7x:2x2x1
jax: 0.10.0
libtpu: 0.0.40
codegen_flags: <defaults>
</compile_context>

<pallas_src>
import functools

import numpy as np
import jax
import jax.numpy as jnp
from jax.experimental import pallas as pl
from jax.experimental.pallas import tpu as pltpu


def _round_up(x, m):
    return ((x + m - 1) // m) * m


def _conv_geom(h, w):
    oh1, ow1 = (h - 8) // 4 + 1, (w - 8) // 4 + 1      # conv1 k=8 s=4
    oh2, ow2 = (oh1 - 4) // 2 + 1, (ow1 - 4) // 2 + 1  # conv2 k=4 s=2
    oh3, ow3 = (oh2 - 3) // 1 + 1, (ow2 - 3) // 1 + 1  # conv3 k=3 s=1
    return (oh1, ow1), (oh2, ow2), (oh3, ow3)


def _conv_out_size(input_shape):
    _, h, w = input_shape
    (_, _), (_, _), (oh3, ow3) = _conv_geom(h, w)
    return 64 * oh3 * ow3


# ----------------------------------------------------------------------------
# Pallas kernel 1: fused conv1+conv2+conv3 (+biases, ReLUs) per batch element.
#   cols1_ref : (1, M1, K1) bf16   im2col of the input for conv1
#   w1_ref    : (K1, 32)    bf16   b1_ref : (1, 32) f32
#   s2_ref    : (16, M2, M1) bf16  0/1 shift-selection matrices for conv2
#   w2_ref    : (16, 32, 64) bf16  b2_ref : (1, 64) f32
#   s3_ref    : (9, M3, M2)  bf16  0/1 shift-selection matrices for conv3
#   w3_ref    : (9, 64, 64)  bf16  b3_ref : (1, 64) f32
#   o_ref     : (1, M3, 64)  bf16
# All intermediates stay in VMEM/vregs; nothing round-trips HBM.
# ----------------------------------------------------------------------------
def _fused_convs_kernel(cols1_ref, w1_ref, b1_ref,
                        s2_ref, w2_ref, b2_ref,
                        s3_ref, w3_ref, b3_ref, o_ref):
    # conv1: im2col rows stream through the MXU, small weight is stationary.
    h = jnp.dot(cols1_ref[0], w1_ref[...], preferred_element_type=jnp.float32)
    h = jnp.maximum(h + b1_ref[...], 0.0).astype(jnp.bfloat16)        # (M1, 32)

    # conv2 (k=4, s=2): 16 shift terms.  Each term gathers its strided spatial
    # window with a 0/1 selection matmul (exact for bf16 values) and contracts
    # input channels with the per-tap weight.
    m2, c2 = s2_ref.shape[1], w2_ref.shape[2]
    acc = jnp.zeros((m2, c2), jnp.float32)
    for t in range(s2_ref.shape[0]):
        g = jnp.dot(s2_ref[t], h, preferred_element_type=jnp.float32)
        acc = acc + jnp.dot(g.astype(jnp.bfloat16), w2_ref[t],
                            preferred_element_type=jnp.float32)
    h = jnp.maximum(acc + b2_ref[...], 0.0).astype(jnp.bfloat16)      # (M2, 64)

    # conv3 (k=3, s=1): 9 shift terms, same scheme.
    m3, c3 = s3_ref.shape[1], w3_ref.shape[2]
    acc = jnp.zeros((m3, c3), jnp.float32)
    for t in range(s3_ref.shape[0]):
        g = jnp.dot(s3_ref[t], h, preferred_element_type=jnp.float32)
        acc = acc + jnp.dot(g.astype(jnp.bfloat16), w3_ref[t],
                            preferred_element_type=jnp.float32)
    h = jnp.maximum(acc + b3_ref[...], 0.0)                           # (M3, 64)

    o_ref[0] = h.astype(o_ref.dtype)


def fused_convs(cols1, cp, s2, s3):
    """cols1: (B, M1, K1) bf16 -> (B, M3, 64) bf16 (post-ReLU conv features)."""
    B, M1, K1 = cols1.shape
    C1 = cp["w1"].shape[1]
    n_t2, M2, _ = s2.shape
    C2 = cp["w2"].shape[2]
    n_t3, M3, _ = s3.shape
    C3 = cp["w3"].shape[2]

    flops = B * (2 * M1 * K1 * C1
                 + n_t2 * (2 * M2 * M1 * C1 + 2 * M2 * C1 * C2)
                 + n_t3 * (2 * M3 * M2 * C2 + 2 * M3 * C2 * C3))
    bytes_accessed = (cols1.size + cp["w1"].size + s2.size + cp["w2"].size
                      + s3.size + cp["w3"].size + B * M3 * C3) * 2 \
        + (C1 + C2 + C3) * 4

    return pl.pallas_call(
        _fused_convs_kernel,
        out_shape=jax.ShapeDtypeStruct((B, M3, C3), jnp.bfloat16),
        grid_spec=pltpu.PrefetchScalarGridSpec(
            num_scalar_prefetch=0,
            grid=(B,),
            in_specs=[
                pl.BlockSpec((1, M1, K1), lambda b: (b, 0, 0)),      # per-batch cols
                pl.BlockSpec((K1, C1), lambda b: (0, 0)),            # resident weights
                pl.BlockSpec((1, C1), lambda b: (0, 0)),
                pl.BlockSpec((n_t2, M2, M1), lambda b: (0, 0, 0)),
                pl.BlockSpec((n_t2, C1, C2), lambda b: (0, 0, 0)),
                pl.BlockSpec((1, C2), lambda b: (0, 0)),
                pl.BlockSpec((n_t3, M3, M2), lambda b: (0, 0, 0)),
                pl.BlockSpec((n_t3, C2, C3), lambda b: (0, 0, 0)),
                pl.BlockSpec((1, C3), lambda b: (0, 0)),
            ],
            out_specs=pl.BlockSpec((1, M3, C3), lambda b: (b, 0, 0)),
        ),
        compiler_params=pltpu.CompilerParams(
            dimension_semantics=("parallel",)),           # 2 TCs on v7x for B>=2
        cost_estimate=pl.CostEstimate(
            flops=flops, transcendentals=0, bytes_accessed=bytes_accessed),
    )(cols1, cp["w1"], cp["b1"], s2, cp["w2"], cp["b2"],
      s3, cp["w3"], cp["b3"])


# ----------------------------------------------------------------------------
# Pallas kernel 2: fused FC head  relu(x@W1+b1) @ W2 + b2
#   x_ref  : (TM, K)     bf16
#   w1_ref : (K, 512)    bf16    b1_ref : (1, 512)  f32
#   w2_ref : (512, Npad) bf16    b2_ref : (1, Npad) f32  (Npad = 128-padded)
#   o_ref  : (TM, Npad)  f32
# ----------------------------------------------------------------------------
def _fc_head_kernel(x_ref, w1_ref, b1_ref, w2_ref, b2_ref, o_ref):
    h = jnp.dot(x_ref[...], w1_ref[...], preferred_element_type=jnp.float32)
    h = jnp.maximum(h + b1_ref[...], 0.0)
    o = jnp.dot(h.astype(jnp.bfloat16), w2_ref[...],
                preferred_element_type=jnp.float32)
    o_ref[...] = (o + b2_ref[...]).astype(o_ref.dtype)


def fc_head(x, w1, b1, w2p, b2p, *, n_actions, tm=256):
    B, K = x.shape
    K2, H = w1.shape
    H2, n_pad = w2p.shape
    assert K == K2 and H == H2

    b_pad = _round_up(max(B, 16), 16)
    tm = min(tm, b_pad)
    if b_pad % tm:
        b_pad = _round_up(b_pad, tm)
    if b_pad != B:
        x = jnp.pad(x, ((0, b_pad - B), (0, 0)))
    x = x.astype(jnp.bfloat16)       # no-op: conv kernel already emits bf16

    grid = (b_pad // tm,)
    flops = 2 * b_pad * K * H + 2 * b_pad * H * n_pad
    bytes_accessed = (b_pad * K + K * H + H * n_pad) * 2 \
        + (H + n_pad) * 4 + b_pad * n_pad * 4

    out = pl.pallas_call(
        _fc_head_kernel,
        out_shape=jax.ShapeDtypeStruct((b_pad, n_pad), jnp.float32),
        grid_spec=pltpu.PrefetchScalarGridSpec(
            num_scalar_prefetch=0,
            grid=grid,
            in_specs=[
                pl.BlockSpec((tm, K), lambda i: (i, 0)),
                pl.BlockSpec((K, H), lambda i: (0, 0)),
                pl.BlockSpec((1, H), lambda i: (0, 0)),
                pl.BlockSpec((H, n_pad), lambda i: (0, 0)),
                pl.BlockSpec((1, n_pad), lambda i: (0, 0)),
            ],
            out_specs=pl.BlockSpec((tm, n_pad), lambda i: (i, 0)),
        ),
        compiler_params=pltpu.CompilerParams(
            dimension_semantics=("parallel",)),
        cost_estimate=pl.CostEstimate(
            flops=flops, transcendentals=0, bytes_accessed=bytes_accessed),
    )(x, w1, b1, w2p, b2p)

    return out[:B, :n_actions]


# ----------------------------------------------------------------------------
# im2col glue for conv1 only (operates directly on the bf16 input)
# ----------------------------------------------------------------------------
def _im2col_nhwc(x_nhwc, k, s):
    """(B, H, W, C) -> (B, OH*OW, k*k*C); patch order (kh, kw, c)."""
    B, H, W, C = x_nhwc.shape
    OH = (H - k) // s + 1
    OW = (W - k) // s + 1
    patches = []
    for kh in range(k):
        for kw in range(k):
            patches.append(x_nhwc[:, kh:kh + s * OH:s, kw:kw + s * OW:s, :])
    p = jnp.stack(patches, axis=3)                    # (B, OH, OW, k*k, C)
    return p.reshape(B, OH * OW, k * k * C), OH, OW


def _shift_selectors(oh_in, ow_in, k, s):
    """0/1 matrices: sel[t] @ flat(activation) = shifted/strided window for tap t."""
    oh_out = (oh_in - k) // s + 1
    ow_out = (ow_in - k) // s + 1
    sel = np.zeros((k * k, oh_out * ow_out, oh_in * ow_in), np.float32)
    for kh in range(k):
        for kw in range(k):
            t = kh * k + kw
            for p in range(oh_out):
                for q in range(ow_out):
                    sel[t, p * ow_out + q,
                        (s * p + kh) * ow_in + (s * q + kw)] = 1.0
    return jnp.asarray(sel, jnp.bfloat16)


# ----------------------------------------------------------------------------
# Parameter init (PyTorch layout) + one-time packing into kernel layout
# ----------------------------------------------------------------------------
def _uniform(key, shape, fan_in):
    bound = 1.0 / jnp.sqrt(jnp.array(fan_in, jnp.float32))
    return jax.random.uniform(key, shape, jnp.float32, -bound, bound)


def init_params(key, input_shape, n_actions):
    """Raw parameters in PyTorch layout (f32)."""
    c_in = input_shape[0]
    keys = jax.random.split(key, 10)
    conv = {
        "w1": _uniform(keys[0], (32, c_in, 8, 8), c_in * 8 * 8),
        "b1": _uniform(keys[1], (32,), c_in * 8 * 8),
        "w2": _uniform(keys[2], (64, 32, 4, 4), 32 * 4 * 4),
        "b2": _uniform(keys[3], (64,), 32 * 4 * 4),
        "w3": _uniform(keys[4], (64, 64, 3, 3), 64 * 3 * 3),
        "b3": _uniform(keys[5], (64,), 64 * 3 * 3),
    }
    conv_out = _conv_out_size(input_shape)
    fc = {
        "w1": _uniform(keys[6], (512, conv_out), conv_out),   # PyTorch (out, in)
        "b1": _uniform(keys[7], (512,), conv_out),
        "w2": _uniform(keys[8], (n_actions, 512), 512),
        "b2": _uniform(keys[9], (n_actions,), 512),
    }
    # target = copy.deepcopy(online) at construction -> identical values
    return {"online": conv,
            "target": jax.tree_util.tree_map(lambda a: a, conv),
            "fc": fc}


def pack_params(raw, input_shape, n_actions):
    """Pre-transpose / pre-cast everything ONCE into the kernels' layouts."""
    _, H, W = input_shape
    (oh1, ow1), (oh2, ow2), (oh3, ow3) = _conv_geom(H, W)
    m3 = oh3 * ow3

    def pack_w_matmul(w):            # (Cout,Cin,KH,KW) -> (KH*KW*Cin, Cout)
        return jnp.transpose(w, (2, 3, 1, 0)).reshape(-1, w.shape[0]) \
                  .astype(jnp.bfloat16)

    def pack_w_terms(w):             # (Cout,Cin,KH,KW) -> (KH*KW, Cin, Cout)
        co, ci, kh, kw = w.shape
        return jnp.transpose(w, (2, 3, 1, 0)).reshape(kh * kw, ci, co) \
                  .astype(jnp.bfloat16)

    def brow(b):
        return b.reshape(1, -1).astype(jnp.float32)

    packed = {}
    for name in ("online", "target"):
        cp = raw[name]
        packed[name] = {
            "w1": pack_w_matmul(cp["w1"]), "b1": brow(cp["b1"]),
            "w2": pack_w_terms(cp["w2"]),  "b2": brow(cp["b2"]),
            "w3": pack_w_terms(cp["w3"]),  "b3": brow(cp["b3"]),
        }

    packed["s2"] = _shift_selectors(oh1, ow1, 4, 2)    # conv2 shift gathers
    packed["s3"] = _shift_selectors(oh2, ow2, 3, 1)    # conv3 shift gathers

    fc = raw["fc"]
    hidden = fc["w1"].shape[0]
    n_pad = _round_up(n_actions, 128)
    # PyTorch flattens conv features channel-major (c, oh, ow); the conv kernel
    # emits (oh*ow, c), so permute FC1's input rows once here to match.
    w1p = (fc["w1"].T.reshape(64, m3, hidden).transpose(1, 0, 2)
           .reshape(m3 * 64, hidden).astype(jnp.bfloat16))
    packed["fc"] = {
        "w1": w1p,                                              # (conv_out, 512)
        "b1": brow(fc["b1"]),                                   # (1, 512)
        "w2p": jnp.pad(fc["w2"].T, ((0, 0), (0, n_pad - n_actions))
                       ).astype(jnp.bfloat16),                  # (512, n_pad)
        "b2p": jnp.pad(fc["b2"], (0, n_pad - n_actions)).reshape(1, -1)
                  .astype(jnp.float32),                         # (1, n_pad)
    }
    return packed


# ----------------------------------------------------------------------------
# DQN forward (matches DQN.forward(x, model)) — 2 pallas_calls total
# ----------------------------------------------------------------------------
@functools.partial(jax.jit, static_argnames=("model", "n_actions"))
def dqn_forward(x, packed, model="online", *, n_actions):
    x = x.astype(jnp.bfloat16)                       # single cast (review #2)
    x_nhwc = jnp.transpose(x, (0, 2, 3, 1))
    # TODO(synk): conv1 patch extraction is still XLA glue; an in-kernel DMA
    # gather of the raw input would remove this last HBM copy.
    cols1, _, _ = _im2col_nhwc(x_nhwc, 8, 4)
    cp = packed[model]
    h3 = fused_convs(cols1, cp, packed["s2"], packed["s3"])   # (B, M3, 64) bf16
    feat = h3.reshape(x.shape[0], -1)                # free reshape, (m, c) order
    fc = packed["fc"]
    return fc_head(feat, fc["w1"], fc["b1"], fc["w2p"], fc["b2p"],
                   n_actions=n_actions)


# ----------------------------------------------------------------------------
# Pure-JAX reference (f32) for correctness checking
# ----------------------------------------------------------------------------
def ref_forward(x, raw, model):
    cp = raw[model]

    def conv(h, w, b, s):
        y = jax.lax.conv_general_dilated(
            h, w, (s, s), "VALID", dimension_numbers=("NCHW", "OIHW", "NCHW"))
        return jax.nn.relu(y + b.reshape(1, -1, 1, 1))

    h = conv(x.astype(jnp.float32), cp["w1"], cp["b1"], 4)
    h = conv(h, cp["w2"], cp["b2"], 2)
    h = conv(h, cp["w3"], cp["b3"], 1)
    h = h.reshape(x.shape[0], -1)
    h = jax.nn.relu(h @ raw["fc"]["w1"].T + raw["fc"]["b1"])
    return h @ raw["fc"]["w2"].T + raw["fc"]["b2"]


if __name__ == "__main__":
    # Small Atari-like stacked-frame input: 4 channels, 36x36 spatial, batch=2.
    # Conv pipeline: 36 -> 8 -> 3 -> 1, so conv_out_size = 64.
    input_shape = (4, 36, 36)
    n_actions = 6
    batch = 2

    key = jax.random.PRNGKey(0)
    k_x, k_p = jax.random.split(key)
    x = jax.random.normal(k_x, (batch,) + input_shape, jnp.float32)

    raw_params = init_params(k_p, input_shape, n_actions)
    packed = pack_params(raw_params, input_shape, n_actions)

    q_online = dqn_forward(x, packed, model="online", n_actions=n_actions)
    q_target = dqn_forward(x, packed, model="target", n_actions=n_actions)
    jax.block_until_ready((q_online, q_target))

    assert q_online.shape == (batch, n_actions)
    assert q_target.shape == (batch, n_actions)
    # target is a deep copy of online at construction -> identical outputs
    assert bool(jnp.allclose(q_online, q_target))

    # Numerical check against the f32 pure-JAX reference (bf16 matmuls -> loose tol).
    q_ref = ref_forward(x, raw_params, "online")
    assert bool(jnp.allclose(q_online, q_ref, rtol=1e-1, atol=1e-1)), (
        "mismatch vs reference: "
        f"max abs diff {float(jnp.max(jnp.abs(q_online - q_ref)))}")

    print("KERNEL_OK")
</pallas_src>

<mosaic_0001>
module attributes {stable_mosaic.version = 11 : i64} {
  func.func @_fc_head_kernel(%arg0: i32, %arg1: memref<16x64xbf16, #tpu.memory_space<vmem>>, %arg2: memref<64x512xbf16, #tpu.memory_space<vmem>>, %arg3: memref<1x512xf32, #tpu.memory_space<vmem>>, %arg4: memref<512x128xbf16, #tpu.memory_space<vmem>>, %arg5: memref<1x128xf32, #tpu.memory_space<vmem>>, %arg6: memref<16x128xf32, #tpu.memory_space<vmem>>) attributes {dimension_semantics = [#tpu.dimension_semantics<parallel>], iteration_bounds = array<i64: 1>, scalar_prefetch = 0 : i64, scratch_operands = 0 : i64, tpu.core_type = #tpu.core_type<tc>, window_params = [{transform_indices = @transform_0, window_bounds = array<i64: 16, 64>}, {pipeline_mode = #tpu.pipeline_mode<synchronous>, transform_indices = @transform_1, window_bounds = array<i64: 64, 512>}, {pipeline_mode = #tpu.pipeline_mode<synchronous>, transform_indices = @transform_2, window_bounds = array<i64: 1, 512>}, {pipeline_mode = #tpu.pipeline_mode<synchronous>, transform_indices = @transform_3, window_bounds = array<i64: 512, 128>}, {pipeline_mode = #tpu.pipeline_mode<synchronous>, transform_indices = @transform_4, window_bounds = array<i64: 1, 128>}, {transform_indices = @transform_5, window_bounds = array<i64: 16, 128>}]} {
    %c0 = arith.constant 0 : index
    %c0_0 = arith.constant 0 : index
    %0 = vector.load %arg1[%c0, %c0_0] : memref<16x64xbf16, #tpu.memory_space<vmem>>, vector<16x64xbf16>
    %c0_1 = arith.constant 0 : index
    %c0_2 = arith.constant 0 : index
    %1 = vector.load %arg2[%c0_1, %c0_2] : memref<64x512xbf16, #tpu.memory_space<vmem>>, vector<64x512xbf16>
    %cst = arith.constant dense<0.000000e+00> : vector<16x512xf32>
    %2 = tpu.matmul %0, %1, %cst {dimension_numbers = #tpu.dot_dimension_numbers<[1], [0], [0], [1], [0, 0, 1, 1], [], []>} : vector<16x64xbf16>, vector<64x512xbf16>, vector<16x512xf32> -> vector<16x512xf32>
    %c0_3 = arith.constant 0 : index
    %c0_4 = arith.constant 0 : index
    %3 = vector.load %arg3[%c0_3, %c0_4] : memref<1x512xf32, #tpu.memory_space<vmem>>, vector<1x512xf32>
    %4 = vector.broadcast %3 : vector<1x512xf32> to vector<16x512xf32>
    %5 = arith.addf %2, %4 : vector<16x512xf32>
    %cst_5 = arith.constant 0.000000e+00 : f32
    %6 = vector.broadcast %cst_5 : f32 to vector<16x512xf32>
    %7 = arith.maximumf %5, %6 : vector<16x512xf32>
    %8 = arith.truncf %7 : vector<16x512xf32> to vector<16x512xbf16>
    %c0_6 = arith.constant 0 : index
    %c0_7 = arith.constant 0 : index
    %9 = vector.load %arg4[%c0_6, %c0_7] : memref<512x128xbf16, #tpu.memory_space<vmem>>, vector<512x128xbf16>
    %cst_8 = arith.constant dense<0.000000e+00> : vector<16x128xf32>
    %10 = tpu.matmul %8, %9, %cst_8 {dimension_numbers = #tpu.dot_dimension_numbers<[1], [0], [0], [1], [0, 0, 1, 1], [], []>} : vector<16x512xbf16>, vector<512x128xbf16>, vector<16x128xf32> -> vector<16x128xf32>
    %c0_9 = arith.constant 0 : index
    %c0_10 = arith.constant 0 : index
    %11 = vector.load %arg5[%c0_9, %c0_10] : memref<1x128xf32, #tpu.memory_space<vmem>>, vector<1x128xf32>
    %12 = vector.broadcast %11 : vector<1x128xf32> to vector<16x128xf32>
    %13 = arith.addf %10, %12 : vector<16x128xf32>
    %c0_11 = arith.constant 0 : index
    %c0_12 = arith.constant 0 : index
    %14 = vector.load %arg6[%c0_11, %c0_12] : memref<16x128xf32, #tpu.memory_space<vmem>>, vector<16x128xf32>
    tpu.vector_store %arg6[%c0_11, %c0_12], %13 {strides = array<i32>} : memref<16x128xf32, #tpu.memory_space<vmem>>, vector<16x128xf32>,
    return
  }
  func.func @transform_0(%arg0: i32) -> (i32, i32) {
    %c0_i32 = arith.constant 0 : i32
    %c0_i32_0 = arith.constant 0 : i32
    return %arg0, %c0_i32 : i32, i32
  }
  func.func @transform_1(%arg0: i32) -> (i32, i32) {
    %c0_i32 = arith.constant 0 : i32
    %c0_i32_0 = arith.constant 0 : i32
    %c0_i32_1 = arith.constant 0 : i32
    return %c0_i32, %c0_i32_0 : i32, i32
  }
  func.func @transform_2(%arg0: i32) -> (i32, i32) {
    %c0_i32 = arith.constant 0 : i32
    %c0_i32_0 = arith.constant 0 : i32
    %c0_i32_1 = arith.constant 0 : i32
    return %c0_i32, %c0_i32_0 : i32, i32
  }
  func.func @transform_3(%arg0: i32) -> (i32, i32) {
    %c0_i32 = arith.constant 0 : i32
    %c0_i32_0 = arith.constant 0 : i32
    %c0_i32_1 = arith.constant 0 : i32
    return %c0_i32, %c0_i32_0 : i32, i32
  }
  func.func @transform_4(%arg0: i32) -> (i32, i32) {
    %c0_i32 = arith.constant 0 : i32
    %c0_i32_0 = arith.constant 0 : i32
    %c0_i32_1 = arith.constant 0 : i32
    return %c0_i32, %c0_i32_0 : i32, i32
  }
  func.func @transform_5(%arg0: i32) -> (i32, i32) {
    %c0_i32 = arith.constant 0 : i32
    %c0_i32_0 = arith.constant 0 : i32
    return %arg0, %c0_i32 : i32, i32
  }
}

module attributes {stable_mosaic.version = 11 : i64} {
  func.func @_fused_convs_kernel(%arg0: i32, %arg1: memref<1x64x256xbf16, #tpu.memory_space<vmem>>, %arg2: memref<256x32xbf16, #tpu.memory_space<vmem>>, %arg3: memref<1x32xf32, #tpu.memory_space<vmem>>, %arg4: memref<16x9x64xbf16, #tpu.memory_space<vmem>>, %arg5: memref<16x32x64xbf16, #tpu.memory_space<vmem>>, %arg6: memref<1x64xf32, #tpu.memory_space<vmem>>, %arg7: memref<9x1x9xbf16, #tpu.memory_space<vmem>>, %arg8: memref<9x64x64xbf16, #tpu.memory_space<vmem>>, %arg9: memref<1x64xf32, #tpu.memory_space<vmem>>, %arg10: memref<1x1x64xbf16, #tpu.memory_space<vmem>>) attributes {dimension_semantics = [#tpu.dimension_semantics<parallel>], iteration_bounds = array<i64: 2>, scalar_prefetch = 0 : i64, scratch_operands = 0 : i64, tpu.core_type = #tpu.core_type<tc>, window_params = [{transform_indices = @transform_0, window_bounds = array<i64: 1, 64, 256>}, {pipeline_mode = #tpu.pipeline_mode<synchronous>, transform_indices = @transform_1, window_bounds = array<i64: 256, 32>}, {pipeline_mode = #tpu.pipeline_mode<synchronous>, transform_indices = @transform_2, window_bounds = array<i64: 1, 32>}, {pipeline_mode = #tpu.pipeline_mode<synchronous>, transform_indices = @transform_3, window_bounds = array<i64: 16, 9, 64>}, {pipeline_mode = #tpu.pipeline_mode<synchronous>, transform_indices = @transform_4, window_bounds = array<i64: 16, 32, 64>}, {pipeline_mode = #tpu.pipeline_mode<synchronous>, transform_indices = @transform_5, window_bounds = array<i64: 1, 64>}, {pipeline_mode = #tpu.pipeline_mode<synchronous>, transform_indices = @transform_6, window_bounds = array<i64: 9, 1, 9>}, {pipeline_mode = #tpu.pipeline_mode<synchronous>, transform_indices = @transform_7, window_bounds = array<i64: 9, 64, 64>}, {pipeline_mode = #tpu.pipeline_mode<synchronous>, transform_indices = @transform_8, window_bounds = array<i64: 1, 64>}, {transform_indices = @transform_9, window_bounds = array<i64: 1, 1, 64>}]} {
    %c0 = arith.constant 0 : index
    %c0_0 = arith.constant 0 : index
    %c0_1 = arith.constant 0 : index
    %0 = vector.load %arg1[%c0, %c0_0, %c0_1] : memref<1x64x256xbf16, #tpu.memory_space<vmem>>, vector<1x64x256xbf16>
    %1 = vector.shape_cast %0 : vector<1x64x256xbf16> to vector<64x256xbf16>
    %c0_2 = arith.constant 0 : index
    %c0_3 = arith.constant 0 : index
    %2 = vector.load %arg2[%c0_2, %c0_3] : memref<256x32xbf16, #tpu.memory_space<vmem>>, vector<256x32xbf16>
    %cst = arith.constant dense<0.000000e+00> : vector<64x32xf32>
    %3 = tpu.matmul %1, %2, %cst {dimension_numbers = #tpu.dot_dimension_numbers<[1], [0], [0], [1], [0, 0, 1, 1], [], []>} : vector<64x256xbf16>, vector<256x32xbf16>, vector<64x32xf32> -> vector<64x32xf32>
    %c0_4 = arith.constant 0 : index
    %c0_5 = arith.constant 0 : index
    %4 = vector.load %arg3[%c0_4, %c0_5] : memref<1x32xf32, #tpu.memory_space<vmem>>, vector<1x32xf32>
    %5 = vector.broadcast %4 : vector<1x32xf32> to vector<64x32xf32>
    %6 = arith.addf %3, %5 : vector<64x32xf32>
    %cst_6 = arith.constant 0.000000e+00 : f32
    %7 = vector.broadcast %cst_6 : f32 to vector<64x32xf32>
    %8 = arith.maximumf %6, %7 : vector<64x32xf32>
    %9 = arith.truncf %8 : vector<64x32xf32> to vector<64x32xbf16>
    %cst_7 = arith.constant 0.000000e+00 : f32
    %10 = vector.broadcast %cst_7 : f32 to vector<9x64xf32>
    %c0_8 = arith.constant 0 : index
    %c0_9 = arith.constant 0 : index
    %c0_10 = arith.constant 0 : index
    %11 = vector.load %arg4[%c0_8, %c0_9, %c0_10] : memref<16x9x64xbf16, #tpu.memory_space<vmem>>, vector<1x9x64xbf16>
    %12 = vector.shape_cast %11 : vector<1x9x64xbf16> to vector<9x64xbf16>
    %cst_11 = arith.constant dense<0.000000e+00> : vector<9x32xf32>
    %13 = tpu.matmul %12, %9, %cst_11 {dimension_numbers = #tpu.dot_dimension_numbers<[1], [0], [0], [1], [0, 0, 1, 1], [], []>} : vector<9x64xbf16>, vector<64x32xbf16>, vector<9x32xf32> -> vector<9x32xf32>
    %14 = arith.truncf %13 : vector<9x32xf32> to vector<9x32xbf16>
    %c0_12 = arith.constant 0 : index
    %c0_13 = arith.constant 0 : index
    %c0_14 = arith.constant 0 : index
    %15 = vector.load %arg5[%c0_12, %c0_13, %c0_14] : memref<16x32x64xbf16, #tpu.memory_space<vmem>>, vector<1x32x64xbf16>
    %16 = vector.shape_cast %15 : vector<1x32x64xbf16> to vector<32x64xbf16>
    %cst_15 = arith.constant dense<0.000000e+00> : vector<9x64xf32>
    %17 = tpu.matmul %14, %16, %cst_15 {dimension_numbers = #tpu.dot_dimension_numbers<[1], [0], [0], [1], [0, 0, 1, 1], [], []>} : vector<9x32xbf16>, vector<32x64xbf16>, vector<9x64xf32> -> vector<9x64xf32>
    %18 = arith.addf %10, %17 : vector<9x64xf32>
    %c1 = arith.constant 1 : index
    %c0_16 = arith.constant 0 : index
    %c0_17 = arith.constant 0 : index
    %19 = vector.load %arg4[%c1, %c0_16, %c0_17] : memref<16x9x64xbf16, #tpu.memory_space<vmem>>, vector<1x9x64xbf16>
    %20 = vector.shape_cast %19 : vector<1x9x64xbf16> to vector<9x64xbf16>
    %cst_18 = arith.constant dense<0.000000e+00> : vector<9x32xf32>
    %21 = tpu.matmul %20, %9, %cst_18 {dimension_numbers = #tpu.dot_dimension_numbers<[1], [0], [0], [1], [0, 0, 1, 1], [], []>} : vector<9x64xbf16>, vector<64x32xbf16>, vector<9x32xf32> -> vector<9x32xf32>
    %22 = arith.truncf %21 : vector<9x32xf32> to vector<9x32xbf16>
    %c1_19 = arith.constant 1 : index
    %c0_20 = arith.constant 0 : index
    %c0_21 = arith.constant 0 : index
    %23 = vector.load %arg5[%c1_19, %c0_20, %c0_21] : memref<16x32x64xbf16, #tpu.memory_space<vmem>>, vector<1x32x64xbf16>
    %24 = vector.shape_cast %23 : vector<1x32x64xbf16> to vector<32x64xbf16>
    %cst_22 = arith.constant dense<0.000000e+00> : vector<9x64xf32>
    %25 = tpu.matmul %22, %24, %cst_22 {dimension_numbers = #tpu.dot_dimension_numbers<[1], [0], [0], [1], [0, 0, 1, 1], [], []>} : vector<9x32xbf16>, vector<32x64xbf16>, vector<9x64xf32> -> vector<9x64xf32>
    %26 = arith.addf %18, %25 : vector<9x64xf32>
    %c2 = arith.constant 2 : index
    %c0_23 = arith.constant 0 : index
    %c0_24 = arith.constant 0 : index
    %27 = vector.load %arg4[%c2, %c0_23, %c0_24] : memref<16x9x64xbf16, #tpu.memory_space<vmem>>, vector<1x9x64xbf16>
    %28 = vector.shape_cast %27 : vector<1x9x64xbf16> to vector<9x64xbf16>
    %cst_25 = arith.constant dense<0.000000e+00> : vector<9x32xf32>
    %29 = tpu.matmul %28, %9, %cst_25 {dimension_numbers = #tpu.dot_dimension_numbers<[1], [0], [0], [1], [0, 0, 1, 1], [], []>} : vector<9x64xbf16>, vector<64x32xbf16>, vector<9x32xf32> -> vector<9x32xf32>
    %30 = arith.truncf %29 : vector<9x32xf32> to vector<9x32xbf16>
    %c2_26 = arith.constant 2 : index
    %c0_27 = arith.constant 0 : index
    %c0_28 = arith.constant 0 : index
    %31 = vector.load %arg5[%c2_26, %c0_27, %c0_28] : memref<16x32x64xbf16, #tpu.memory_space<vmem>>, vector<1x32x64xbf16>
    %32 = vector.shape_cast %31 : vector<1x32x64xbf16> to vector<32x64xbf16>
    %cst_29 = arith.constant dense<0.000000e+00> : vector<9x64xf32>
    %33 = tpu.matmul %30, %32, %cst_29 {dimension_numbers = #tpu.dot_dimension_numbers<[1], [0], [0], [1], [0, 0, 1, 1], [], []>} : vector<9x32xbf16>, vector<32x64xbf16>, vector<9x64xf32> -> vector<9x64xf32>
    %34 = arith.addf %26, %33 : vector<9x64xf32>
    %c3 = arith.constant 3 : index
    %c0_30 = arith.constant 0 : index
    %c0_31 = arith.constant 0 : index
    %35 = vector.load %arg4[%c3, %c0_30, %c0_31] : memref<16x9x64xbf16, #tpu.memory_space<vmem>>, vector<1x9x64xbf16>
    %36 = vector.shape_cast %35 : vector<1x9x64xbf16> to vector<9x64xbf16>
    %cst_32 = arith.constant dense<0.000000e+00> : vector<9x32xf32>
    %37 = tpu.matmul %36, %9, %cst_32 {dimension_numbers = #tpu.dot_dimension_numbers<[1], [0], [0], [1], [0, 0, 1, 1], [], []>} : vector<9x64xbf16>, vector<64x32xbf16>, vector<9x32xf32> -> vector<9x32xf32>
    %38 = arith.truncf %37 : vector<9x32xf32> to vector<9x32xbf16>
    %c3_33 = arith.constant 3 : index
    %c0_34 = arith.constant 0 : index
    %c0_35 = arith.constant 0 : index
    %39 = vector.load %arg5[%c3_33, %c0_34, %c0_35] : memref<16x32x64xbf16, #tpu.memory_space<vmem>>, vector<1x32x64xbf16>
    %40 = vector.shape_cast %39 : vector<1x32x64xbf16> to vector<32x64xbf16>
    %cst_36 = arith.constant dense<0.000000e+00> : vector<9x64xf32>
    %41 = tpu.matmul %38, %40, %cst_36 {dimension_numbers = #tpu.dot_dimension_numbers<[1], [0], [0], [1], [0, 0, 1, 1], [], []>} : vector<9x32xbf16>, vector<32x64xbf16>, vector<9x64xf32> -> vector<9x64xf32>
    %42 = arith.addf %34, %41 : vector<9x64xf32>
    %c4 = arith.constant 4 : index
    %c0_37 = arith.constant 0 : index
    %c0_38 = arith.constant 0 : index
    %43 = vector.load %arg4[%c4, %c0_37, %c0_38] : memref<16x9x64xbf16, #tpu.memory_space<vmem>>, vector<1x9x64xbf16>
    %44 = vector.shape_cast %43 : vector<1x9x64xbf16> to vector<9x64xbf16>
    %cst_39 = arith.constant dense<0.000000e+00> : vector<9x32xf32>
    %45 = tpu.matmul %44, %9, %cst_39 {dimension_numbers = #tpu.dot_dimension_numbers<[1], [0], [0], [1], [0, 0, 1, 1], [], []>} : vector<9x64xbf16>, vector<64x32xbf16>, vector<9x32xf32> -> vector<9x32xf32>
    %46 = arith.truncf %45 : vector<9x32xf32> to vector<9x32xbf16>
    %c4_40 = arith.constant 4 : index
    %c0_41 = arith.constant 0 : index
    %c0_42 = arith.constant 0 : index
    %47 = vector.load %arg5[%c4_40, %c0_41, %c0_42] : memref<16x32x64xbf16, #tpu.memory_space<vmem>>, vector<1x32x64xbf16>
    %48 = vector.shape_cast %47 : vector<1x32x64xbf16> to vector<32x64xbf16>
    %cst_43 = arith.constant dense<0.000000e+00> : vector<9x64xf32>
    %49 = tpu.matmul %46, %48, %cst_43 {dimension_numbers = #tpu.dot_dimension_numbers<[1], [0], [0], [1], [0, 0, 1, 1], [], []>} : vector<9x32xbf16>, vector<32x64xbf16>, vector<9x64xf32> -> vector<9x64xf32>
    %50 = arith.addf %42, %49 : vector<9x64xf32>
    %c5 = arith.constant 5 : index
    %c0_44 = arith.constant 0 : index
    %c0_45 = arith.constant 0 : index
    %51 = vector.load %arg4[%c5, %c0_44, %c0_45] : memref<16x9x64xbf16, #tpu.memory_space<vmem>>, vector<1x9x64xbf16>
    %52 = vector.shape_cast %51 : vector<1x9x64xbf16> to vector<9x64xbf16>
    %cst_46 = arith.constant dense<0.000000e+00> : vector<9x32xf32>
    %53 = tpu.matmul %52, %9, %cst_46 {dimension_numbers = #tpu.dot_dimension_numbers<[1], [0], [0], [1], [0, 0, 1, 1], [], []>} : vector<9x64xbf16>, vector<64x32xbf16>, vector<9x32xf32> -> vector<9x32xf32>
    %54 = arith.truncf %53 : vector<9x32xf32> to vector<9x32xbf16>
    %c5_47 = arith.constant 5 : index
    %c0_48 = arith.constant 0 : index
    %c0_49 = arith.constant 0 : index
    %55 = vector.load %arg5[%c5_47, %c0_48, %c0_49] : memref<16x32x64xbf16, #tpu.memory_space<vmem>>, vector<1x32x64xbf16>
    %56 = vector.shape_cast %55 : vector<1x32x64xbf16> to vector<32x64xbf16>
    %cst_50 = arith.constant dense<0.000000e+00> : vector<9x64xf32>
    %57 = tpu.matmul %54, %56, %cst_50 {dimension_numbers = #tpu.dot_dimension_numbers<[1], [0], [0], [1], [0, 0, 1, 1], [], []>} : vector<9x32xbf16>, vector<32x64xbf16>, vector<9x64xf32> -> vector<9x64xf32>
    %58 = arith.addf %50, %57 : vector<9x64xf32>
    %c6 = arith.constant 6 : index
    %c0_51 = arith.constant 0 : index
    %c0_52 = arith.constant 0 : index
    %59 = vector.load %arg4[%c6, %c0_51, %c0_52] : memref<16x9x64xbf16, #tpu.memory_space<vmem>>, vector<1x9x64xbf16>
    %60 = vector.shape_cast %59 : vector<1x9x64xbf16> to vector<9x64xbf16>
    %cst_53 = arith.constant dense<0.000000e+00> : vector<9x32xf32>
    %61 = tpu.matmul %60, %9, %cst_53 {dimension_numbers = #tpu.dot_dimension_numbers<[1], [0], [0], [1], [0, 0, 1, 1], [], []>} : vector<9x64xbf16>, vector<64x32xbf16>, vector<9x32xf32> -> vector<9x32xf32>
    %62 = arith.truncf %61 : vector<9x32xf32> to vector<9x32xbf16>
    %c6_54 = arith.constant 6 : index
    %c0_55 = arith.constant 0 : index
    %c0_56 = arith.constant 0 : index
    %63 = vector.load %arg5[%c6_54, %c0_55, %c0_56] : memref<16x32x64xbf16, #tpu.memory_space<vmem>>, vector<1x32x64xbf16>
    %64 = vector.shape_cast %63 : vector<1x32x64xbf16> to vector<32x64xbf16>
    %cst_57 = arith.constant dense<0.000000e+00> : vector<9x64xf32>
    %65 = tpu.matmul %62, %64, %cst_57 {dimension_numbers = #tpu.dot_dimension_numbers<[1], [0], [0], [1], [0, 0, 1, 1], [], []>} : vector<9x32xbf16>, vector<32x64xbf16>, vector<9x64xf32> -> vector<9x64xf32>
    %66 = arith.addf %58, %65 : vector<9x64xf32>
    %c7 = arith.constant 7 : index
    %c0_58 = arith.constant 0 : index
    %c0_59 = arith.constant 0 : index
    %67 = vector.load %arg4[%c7, %c0_58, %c0_59] : memref<16x9x64xbf16, #tpu.memory_space<vmem>>, vector<1x9x64xbf16>
    %68 = vector.shape_cast %67 : vector<1x9x64xbf16> to vector<9x64xbf16>
    %cst_60 = arith.constant dense<0.000000e+00> : vector<9x32xf32>
    %69 = tpu.matmul %68, %9, %cst_60 {dimension_numbers = #tpu.dot_dimension_numbers<[1], [0], [0], [1], [0, 0, 1, 1], [], []>} : vector<9x64xbf16>, vector<64x32xbf16>, vector<9x32xf32> -> vector<9x32xf32>
    %70 = arith.truncf %69 : vector<9x32xf32> to vector<9x32xbf16>
    %c7_61 = arith.constant 7 : index
    %c0_62 = arith.constant 0 : index
    %c0_63 = arith.constant 0 : index
    %71 = vector.load %arg5[%c7_61, %c0_62, %c0_63] : memref<16x32x64xbf16, #tpu.memory_space<vmem>>, vector<1x32x64xbf16>
    %72 = vector.shape_cast %71 : vector<1x32x64xbf16> to vector<32x64xbf16>
    %cst_64 = arith.constant dense<0.000000e+00> : vector<9x64xf32>
    %73 = tpu.matmul %70, %72, %cst_64 {dimension_numbers = #tpu.dot_dimension_numbers<[1], [0], [0], [1], [0, 0, 1, 1], [], []>} : vector<9x32xbf16>, vector<32x64xbf16>, vector<9x64xf32> -> vector<9x64xf32>
    %74 = arith.addf %66, %73 : vector<9x64xf32>
    %c8 = arith.constant 8 : index
    %c0_65 = arith.constant 0 : index
    %c0_66 = arith.constant 0 : index
    %75 = vector.load %arg4[%c8, %c0_65, %c0_66] : memref<16x9x64xbf16, #tpu.memory_space<vmem>>, vector<1x9x64xbf16>
    %76 = vector.shape_cast %75 : vector<1x9x64xbf16> to vector<9x64xbf16>
    %cst_67 = arith.constant dense<0.000000e+00> : vector<9x32xf32>
    %77 = tpu.matmul %76, %9, %cst_67 {dimension_numbers = #tpu.dot_dimension_numbers<[1], [0], [0], [1], [0, 0, 1, 1], [], []>} : vector<9x64xbf16>, vector<64x32xbf16>, vector<9x32xf32> -> vector<9x32xf32>
    %78 = arith.truncf %77 : vector<9x32xf32> to vector<9x32xbf16>
    %c8_68 = arith.constant 8 : index
    %c0_69 = arith.constant 0 : index
    %c0_70 = arith.constant 0 : index
    %79 = vector.load %arg5[%c8_68, %c0_69, %c0_70] : memref<16x32x64xbf16, #tpu.memory_space<vmem>>, vector<1x32x64xbf16>
    %80 = vector.shape_cast %79 : vector<1x32x64xbf16> to vector<32x64xbf16>
    %cst_71 = arith.constant dense<0.000000e+00> : vector<9x64xf32>
    %81 = tpu.matmul %78, %80, %cst_71 {dimension_numbers = #tpu.dot_dimension_numbers<[1], [0], [0], [1], [0, 0, 1, 1], [], []>} : vector<9x32xbf16>, vector<32x64xbf16>, vector<9x64xf32> -> vector<9x64xf32>
    %82 = arith.addf %74, %81 : vector<9x64xf32>
    %c9 = arith.constant 9 : index
    %c0_72 = arith.constant 0 : index
    %c0_73 = arith.constant 0 : index
    %83 = vector.load %arg4[%c9, %c0_72, %c0_73] : memref<16x9x64xbf16, #tpu.memory_space<vmem>>, vector<1x9x64xbf16>
    %84 = vector.shape_cast %83 : vector<1x9x64xbf16> to vector<9x64xbf16>
    %cst_74 = arith.constant dense<0.000000e+00> : vector<9x32xf32>
    %85 = tpu.matmul %84, %9, %cst_74 {dimension_numbers = #tpu.dot_dimension_numbers<[1], [0], [0], [1], [0, 0, 1, 1], [], []>} : vector<9x64xbf16>, vector<64x32xbf16>, vector<9x32xf32> -> vector<9x32xf32>
    %86 = arith.truncf %85 : vector<9x32xf32> to vector<9x32xbf16>
    %c9_75 = arith.constant 9 : index
    %c0_76 = arith.constant 0 : index
    %c0_77 = arith.constant 0 : index
    %87 = vector.load %arg5[%c9_75, %c0_76, %c0_77] : memref<16x32x64xbf16, #tpu.memory_space<vmem>>, vector<1x32x64xbf16>
    %88 = vector.shape_cast %87 : vector<1x32x64xbf16> to vector<32x64xbf16>
    %cst_78 = arith.constant dense<0.000000e+00> : vector<9x64xf32>
    %89 = tpu.matmul %86, %88, %cst_78 {dimension_numbers = #tpu.dot_dimension_numbers<[1], [0], [0], [1], [0, 0, 1, 1], [], []>} : vector<9x32xbf16>, vector<32x64xbf16>, vector<9x64xf32> -> vector<9x64xf32>
    %90 = arith.addf %82, %89 : vector<9x64xf32>
    %c10 = arith.constant 10 : index
    %c0_79 = arith.constant 0 : index
    %c0_80 = arith.constant 0 : index
    %91 = vector.load %arg4[%c10, %c0_79, %c0_80] : memref<16x9x64xbf16, #tpu.memory_space<vmem>>, vector<1x9x64xbf16>
    %92 = vector.shape_cast %91 : vector<1x9x64xbf16> to vector<9x64xbf16>
    %cst_81 = arith.constant dense<0.000000e+00> : vector<9x32xf32>
    %93 = tpu.matmul %92, %9, %cst_81 {dimension_numbers = #tpu.dot_dimension_numbers<[1], [0], [0], [1], [0, 0, 1, 1], [], []>} : vector<9x64xbf16>, vector<64x32xbf16>, vector<9x32xf32> -> vector<9x32xf32>
    %94 = arith.truncf %93 : vector<9x32xf32> to vector<9x32xbf16>
    %c10_82 = arith.constant 10 : index
    %c0_83 = arith.constant 0 : index
    %c0_84 = arith.constant 0 : index
    %95 = vector.load %arg5[%c10_82, %c0_83, %c0_84] : memref<16x32x64xbf16, #tpu.memory_space<vmem>>, vector<1x32x64xbf16>
    %96 = vector.shape_cast %95 : vector<1x32x64xbf16> to vector<32x64xbf16>
    %cst_85 = arith.constant dense<0.000000e+00> : vector<9x64xf32>
    %97 = tpu.matmul %94, %96, %cst_85 {dimension_numbers = #tpu.dot_dimension_numbers<[1], [0], [0], [1], [0, 0, 1, 1], [], []>} : vector<9x32xbf16>, vector<32x64xbf16>, vector<9x64xf32> -> vector<9x64xf32>
    %98 = arith.addf %90, %97 : vector<9x64xf32>
    %c11 = arith.constant 11 : index
    %c0_86 = arith.constant 0 : index
    %c0_87 = arith.constant 0 : index
    %99 = vector.load %arg4[%c11, %c0_86, %c0_87] : memref<16x9x64xbf16, #tpu.memory_space<vmem>>, vector<1x9x64xbf16>
    %100 = vector.shape_cast %99 : vector<1x9x64xbf16> to vector<9x64xbf16>
    %cst_88 = arith.constant dense<0.000000e+00> : vector<9x32xf32>
    %101 = tpu.matmul %100, %9, %cst_88 {dimension_numbers = #tpu.dot_dimension_numbers<[1], [0], [0], [1], [0, 0, 1, 1], [], []>} : vector<9x64xbf16>, vector<64x32xbf16>, vector<9x32xf32> -> vector<9x32xf32>
    %102 = arith.truncf %101 : vector<9x32xf32> to vector<9x32xbf16>
    %c11_89 = arith.constant 11 : index
    %c0_90 = arith.constant 0 : index
    %c0_91 = arith.constant 0 : index
    %103 = vector.load %arg5[%c11_89, %c0_90, %c0_91] : memref<16x32x64xbf16, #tpu.memory_space<vmem>>, vector<1x32x64xbf16>
    %104 = vector.shape_cast %103 : vector<1x32x64xbf16> to vector<32x64xbf16>
    %cst_92 = arith.constant dense<0.000000e+00> : vector<9x64xf32>
    %105 = tpu.matmul %102, %104, %cst_92 {dimension_numbers = #tpu.dot_dimension_numbers<[1], [0], [0], [1], [0, 0, 1, 1], [], []>} : vector<9x32xbf16>, vector<32x64xbf16>, vector<9x64xf32> -> vector<9x64xf32>
    %106 = arith.addf %98, %105 : vector<9x64xf32>
    %c12 = arith.constant 12 : index
    %c0_93 = arith.constant 0 : index
    %c0_94 = arith.constant 0 : index
    %107 = vector.load %arg4[%c12, %c0_93, %c0_94] : memref<16x9x64xbf16, #tpu.memory_space<vmem>>, vector<1x9x64xbf16>
    %108 = vector.shape_cast %107 : vector<1x9x64xbf16> to vector<9x64xbf16>
    %cst_95 = arith.constant dense<0.000000e+00> : vector<9x32xf32>
    %109 = tpu.matmul %108, %9, %cst_95 {dimension_numbers = #tpu.dot_dimension_numbers<[1], [0], [0], [1], [0, 0, 1, 1], [], []>} : vector<9x64xbf16>, vector<64x32xbf16>, vector<9x32xf32> -> vector<9x32xf32>
    %110 = arith.truncf %109 : vector<9x32xf32> to vector<9x32xbf16>
    %c12_96 = arith.constant 12 : index
    %c0_97 = arith.constant 0 : index
    %c0_98 = arith.constant 0 : index
    %111 = vector.load %arg5[%c12_96, %c0_97, %c0_98] : memref<16x32x64xbf16, #tpu.memory_space<vmem>>, vector<1x32x64xbf16>
    %112 = vector.shape_cast %111 : vector<1x32x64xbf16> to vector<32x64xbf16>
    %cst_99 = arith.constant dense<0.000000e+00> : vector<9x64xf32>
    %113 = tpu.matmul %110, %112, %cst_99 {dimension_numbers = #tpu.dot_dimension_numbers<[1], [0], [0], [1], [0, 0, 1, 1], [], []>} : vector<9x32xbf16>, vector<32x64xbf16>, vector<9x64xf32> -> vector<9x64xf32>
    %114 = arith.addf %106, %113 : vector<9x64xf32>
    %c13 = arith.constant 13 : index
    %c0_100 = arith.constant 0 : index
    %c0_101 = arith.constant 0 : index
    %115 = vector.load %arg4[%c13, %c0_100, %c0_101] : memref<16x9x64xbf16, #tpu.memory_space<vmem>>, vector<1x9x64xbf16>
    %116 = vector.shape_cast %115 : vector<1x9x64xbf16> to vector<9x64xbf16>
    %cst_102 = arith.constant dense<0.000000e+00> : vector<9x32xf32>
    %117 = tpu.matmul %116, %9, %cst_102 {dimension_numbers = #tpu.dot_dimension_numbers<[1], [0], [0], [1], [0, 0, 1, 1], [], []>} : vector<9x64xbf16>, vector<64x32xbf16>, vector<9x32xf32> -> vector<9x32xf32>
    %118 = arith.truncf %117 : vector<9x32xf32> to vector<9x32xbf16>
    %c13_103 = arith.constant 13 : index
    %c0_104 = arith.constant 0 : index
    %c0_105 = arith.constant 0 : index
    %119 = vector.load %arg5[%c13_103, %c0_104, %c0_105] : memref<16x32x64xbf16, #tpu.memory_space<vmem>>, vector<1x32x64xbf16>
    %120 = vector.shape_cast %119 : vector<1x32x64xbf16> to vector<32x64xbf16>
    %cst_106 = arith.constant dense<0.000000e+00> : vector<9x64xf32>
    %121 = tpu.matmul %118, %120, %cst_106 {dimension_numbers = #tpu.dot_dimension_numbers<[1], [0], [0], [1], [0, 0, 1, 1], [], []>} : vector<9x32xbf16>, vector<32x64xbf16>, vector<9x64xf32> -> vector<9x64xf32>
    %122 = arith.addf %114, %121 : vector<9x64xf32>
    %c14 = arith.constant 14 : index
    %c0_107 = arith.constant 0 : index
    %c0_108 = arith.constant 0 : index
    %123 = vector.load %arg4[%c14, %c0_107, %c0_108] : memref<16x9x64xbf16, #tpu.memory_space<vmem>>, vector<1x9x64xbf16>
    %124 = vector.shape_cast %123 : vector<1x9x64xbf16> to vector<9x64xbf16>
    %cst_109 = arith.constant dense<0.000000e+00> : vector<9x32xf32>
    %125 = tpu.matmul %124, %9, %cst_109 {dimension_numbers = #tpu.dot_dimension_numbers<[1], [0], [0], [1], [0, 0, 1, 1], [], []>} : vector<9x64xbf16>, vector<64x32xbf16>, vector<9x32xf32> -> vector<9x32xf32>
    %126 = arith.truncf %125 : vector<9x32xf32> to vector<9x32xbf16>
    %c14_110 = arith.constant 14 : index
    %c0_111 = arith.constant 0 : index
    %c0_112 = arith.constant 0 : index
    %127 = vector.load %arg5[%c14_110, %c0_111, %c0_112] : memref<16x32x64xbf16, #tpu.memory_space<vmem>>, vector<1x32x64xbf16>
    %128 = vector.shape_cast %127 : vector<1x32x64xbf16> to vector<32x64xbf16>
    %cst_113 = arith.constant dense<0.000000e+00> : vector<9x64xf32>
    %129 = tpu.matmul %126, %128, %cst_113 {dimension_numbers = #tpu.dot_dimension_numbers<[1], [0], [0], [1], [0, 0, 1, 1], [], []>} : vector<9x32xbf16>, vector<32x64xbf16>, vector<9x64xf32> -> vector<9x64xf32>
    %130 = arith.addf %122, %129 : vector<9x64xf32>
    %c15 = arith.constant 15 : index
    %c0_114 = arith.constant 0 : index
    %c0_115 = arith.constant 0 : index
    %131 = vector.load %arg4[%c15, %c0_114, %c0_115] : memref<16x9x64xbf16, #tpu.memory_space<vmem>>, vector<1x9x64xbf16>
    %132 = vector.shape_cast %131 : vector<1x9x64xbf16> to vector<9x64xbf16>
    %cst_116 = arith.constant dense<0.000000e+00> : vector<9x32xf32>
    %133 = tpu.matmul %132, %9, %cst_116 {dimension_numbers = #tpu.dot_dimension_numbers<[1], [0], [0], [1], [0, 0, 1, 1], [], []>} : vector<9x64xbf16>, vector<64x32xbf16>, vector<9x32xf32> -> vector<9x32xf32>
    %134 = arith.truncf %133 : vector<9x32xf32> to vector<9x32xbf16>
    %c15_117 = arith.constant 15 : index
    %c0_118 = arith.constant 0 : index
    %c0_119 = arith.constant 0 : index
    %135 = vector.load %arg5[%c15_117, %c0_118, %c0_119] : memref<16x32x64xbf16, #tpu.memory_space<vmem>>, vector<1x32x64xbf16>
    %136 = vector.shape_cast %135 : vector<1x32x64xbf16> to vector<32x64xbf16>
    %cst_120 = arith.constant dense<0.000000e+00> : vector<9x64xf32>
    %137 = tpu.matmul %134, %136, %cst_120 {dimension_numbers = #tpu.dot_dimension_numbers<[1], [0], [0], [1], [0, 0, 1, 1], [], []>} : vector<9x32xbf16>, vector<32x64xbf16>, vector<9x64xf32> -> vector<9x64xf32>
    %138 = arith.addf %130, %137 : vector<9x64xf32>
    %c0_121 = arith.constant 0 : index
    %c0_122 = arith.constant 0 : index
    %139 = vector.load %arg6[%c0_121, %c0_122] : memref<1x64xf32, #tpu.memory_space<vmem>>, vector<1x64xf32>
    %140 = vector.broadcast %139 : vector<1x64xf32> to vector<9x64xf32>
    %141 = arith.addf %138, %140 : vector<9x64xf32>
    %cst_123 = arith.constant 0.000000e+00 : f32
    %142 = vector.broadcast %cst_123 : f32 to vector<9x64xf32>
    %143 = arith.maximumf %141, %142 : vector<9x64xf32>
    %144 = arith.truncf %143 : vector<9x64xf32> to vector<9x64xbf16>
    %cst_124 = arith.constant 0.000000e+00 : f32
    %145 = vector.broadcast %cst_124 : f32 to vector<1x64xf32>
    %c0_125 = arith.constant 0 : index
    %c0_126 = arith.constant 0 : index
    %c0_127 = arith.constant 0 : index
    %146 = vector.load %arg7[%c0_125, %c0_126, %c0_127] : memref<9x1x9xbf16, #tpu.memory_space<vmem>>, vector<1x1x9xbf16>
    %147 = vector.shape_cast %146 : vector<1x1x9xbf16> to vector<1x9xbf16>
    %cst_128 = arith.constant dense<0.000000e+00> : vector<1x64xf32>
    %148 = tpu.matmul %147, %144, %cst_128 {dimension_numbers = #tpu.dot_dimension_numbers<[1], [0], [0], [1], [0, 0, 1, 1], [], []>} : vector<1x9xbf16>, vector<9x64xbf16>, vector<1x64xf32> -> vector<1x64xf32>
    %149 = arith.truncf %148 : vector<1x64xf32> to vector<1x64xbf16>
    %c0_129 = arith.constant 0 : index
    %c0_130 = arith.constant 0 : index
    %c0_131 = arith.constant 0 : index
    %150 = vector.load %arg8[%c0_129, %c0_130, %c0_131] : memref<9x64x64xbf16, #tpu.memory_space<vmem>>, vector<1x64x64xbf16>
    %151 = vector.shape_cast %150 : vector<1x64x64xbf16> to vector<64x64xbf16>
    %cst_132 = arith.constant dense<0.000000e+00> : vector<1x64xf32>
    %152 = tpu.matmul %149, %151, %cst_132 {dimension_numbers = #tpu.dot_dimension_numbers<[1], [0], [0], [1], [0, 0, 1, 1], [], []>} : vector<1x64xbf16>, vector<64x64xbf16>, vector<1x64xf32> -> vector<1x64xf32>
    %153 = arith.addf %145, %152 : vector<1x64xf32>
    %c1_133 = arith.constant 1 : index
    %c0_134 = arith.constant 0 : index
    %c0_135 = arith.constant 0 : index
    %154 = vector.load %arg7[%c1_133, %c0_134, %c0_135] : memref<9x1x9xbf16, #tpu.memory_space<vmem>>, vector<1x1x9xbf16>
    %155 = vector.shape_cast %154 : vector<1x1x9xbf16> to vector<1x9xbf16>
    %cst_136 = arith.constant dense<0.000000e+00> : vector<1x64xf32>
    %156 = tpu.matmul %155, %144, %cst_136 {dimension_numbers = #tpu.dot_dimension_numbers<[1], [0], [0], [1], [0, 0, 1, 1], [], []>} : vector<1x9xbf16>, vector<9x64xbf16>, vector<1x64xf32> -> vector<1x64xf32>
    %157 = arith.truncf %156 : vector<1x64xf32> to vector<1x64xbf16>
    %c1_137 = arith.constant 1 : index
    %c0_138 = arith.constant 0 : index
    %c0_139 = arith.constant 0 : index
    %158 = vector.load %arg8[%c1_137, %c0_138, %c0_139] : memref<9x64x64xbf16, #tpu.memory_space<vmem>>, vector<1x64x64xbf16>
    %159 = vector.shape_cast %158 : vector<1x64x64xbf16> to vector<64x64xbf16>
    %cst_140 = arith.constant dense<0.000000e+00> : vector<1x64xf32>
    %160 = tpu.matmul %157, %159, %cst_140 {dimension_numbers = #tpu.dot_dimension_numbers<[1], [0], [0], [1], [0, 0, 1, 1], [], []>} : vector<1x64xbf16>, vector<64x64xbf16>, vector<1x64xf32> -> vector<1x64xf32>
    %161 = arith.addf %153, %160 : vector<1x64xf32>
    %c2_141 = arith.constant 2 : index
    %c0_142 = arith.constant 0 : index
    %c0_143 = arith.constant 0 : index
    %162 = vector.load %arg7[%c2_141, %c0_142, %c0_143] : memref<9x1x9xbf16, #tpu.memory_space<vmem>>, vector<1x1x9xbf16>
    %163 = vector.shape_cast %162 : vector<1x1x9xbf16> to vector<1x9xbf16>
    %cst_144 = arith.constant dense<0.000000e+00> : vector<1x64xf32>
    %164 = tpu.matmul %163, %144, %cst_144 {dimension_numbers = #tpu.dot_dimension_numbers<[1], [0], [0], [1], [0, 0, 1, 1], [], []>} : vector<1x9xbf16>, vector<9x64xbf16>, vector<1x64xf32> -> vector<1x64xf32>
    %165 = arith.truncf %164 : vector<1x64xf32> to vector<1x64xbf16>
    %c2_145 = arith.constant 2 : index
    %c0_146 = arith.constant 0 : index
    %c0_147 = arith.constant 0 : index
    %166 = vector.load %arg8[%c2_145, %c0_146, %c0_147] : memref<9x64x64xbf16, #tpu.memory_space<vmem>>, vector<1x64x64xbf16>
    %167 = vector.shape_cast %166 : vector<1x64x64xbf16> to vector<64x64xbf16>
    %cst_148 = arith.constant dense<0.000000e+00> : vector<1x64xf32>
    %168 = tpu.matmul %165, %167, %cst_148 {dimension_numbers = #tpu.dot_dimension_numbers<[1], [0], [0], [1], [0, 0, 1, 1], [], []>} : vector<1x64xbf16>, vector<64x64xbf16>, vector<1x64xf32> -> vector<1x64xf32>
    %169 = arith.addf %161, %168 : vector<1x64xf32>
    %c3_149 = arith.constant 3 : index
    %c0_150 = arith.constant 0 : index
    %c0_151 = arith.constant 0 : index
    %170 = vector.load %arg7[%c3_149, %c0_150, %c0_151] : memref<9x1x9xbf16, #tpu.memory_space<vmem>>, vector<1x1x9xbf16>
    %171 = vector.shape_cast %170 : vector<1x1x9xbf16> to vector<1x9xbf16>
    %cst_152 = arith.constant dense<0.000000e+00> : vector<1x64xf32>
    %172 = tpu.matmul %171, %144, %cst_152 {dimension_numbers = #tpu.dot_dimension_numbers<[1], [0], [0], [1], [0, 0, 1, 1], [], []>} : vector<1x9xbf16>, vector<9x64xbf16>, vector<1x64xf32> -> vector<1x64xf32>
    %173 = arith.truncf %172 : vector<1x64xf32> to vector<1x64xbf16>
    %c3_153 = arith.constant 3 : index
    %c0_154 = arith.constant 0 : index
    %c0_155 = arith.constant 0 : index
    %174 = vector.load %arg8[%c3_153, %c0_154, %c0_155] : memref<9x64x64xbf16, #tpu.memory_space<vmem>>, vector<1x64x64xbf16>
    %175 = vector.shape_cast %174 : vector<1x64x64xbf16> to vector<64x64xbf16>
    %cst_156 = arith.constant dense<0.000000e+00> : vector<1x64xf32>
    %176 = tpu.matmul %173, %175, %cst_156 {dimension_numbers = #tpu.dot_dimension_numbers<[1], [0], [0], [1], [0, 0, 1, 1], [], []>} : vector<1x64xbf16>, vector<64x64xbf16>, vector<1x64xf32> -> vector<1x64xf32>
    %177 = arith.addf %169, %176 : vector<1x64xf32>
    %c4_157 = arith.constant 4 : index
    %c0_158 = arith.constant 0 : index
    %c0_159 = arith.constant 0 : index
    %178 = vector.load %arg7[%c4_157, %c0_158, %c0_159] : memref<9x1x9xbf16, #tpu.memory_space<vmem>>, vector<1x1x9xbf16>
    %179 = vector.shape_cast %178 : vector<1x1x9xbf16> to vector<1x9xbf16>
    %cst_160 = arith.constant dense<0.000000e+00> : vector<1x64xf32>
    %180 = tpu.matmul %179, %144, %cst_160 {dimension_numbers = #tpu.dot_dimension_numbers<[1], [0], [0], [1], [0, 0, 1, 1], [], []>} : vector<1x9xbf16>, vector<9x64xbf16>, vector<1x64xf32> -> vector<1x64xf32>
    %181 = arith.truncf %180 : vector<1x64xf32> to vector<1x64xbf16>
    %c4_161 = arith.constant 4 : index
    %c0_162 = arith.constant 0 : index
    %c0_163 = arith.constant 0 : index
    %182 = vector.load %arg8[%c4_161, %c0_162, %c0_163] : memref<9x64x64xbf16, #tpu.memory_space<vmem>>, vector<1x64x64xbf16>
    %183 = vector.shape_cast %182 : vector<1x64x64xbf16> to vector<64x64xbf16>
    %cst_164 = arith.constant dense<0.000000e+00> : vector<1x64xf32>
    %184 = tpu.matmul %181, %183, %cst_164 {dimension_numbers = #tpu.dot_dimension_numbers<[1], [0], [0], [1], [0, 0, 1, 1], [], []>} : vector<1x64xbf16>, vector<64x64xbf16>, vector<1x64xf32> -> vector<1x64xf32>
    %185 = arith.addf %177, %184 : vector<1x64xf32>
    %c5_165 = arith.constant 5 : index
    %c0_166 = arith.constant 0 : index
    %c0_167 = arith.constant 0 : index
    %186 = vector.load %arg7[%c5_165, %c0_166, %c0_167] : memref<9x1x9xbf16, #tpu.memory_space<vmem>>, vector<1x1x9xbf16>
    %187 = vector.shape_cast %186 : vector<1x1x9xbf16> to vector<1x9xbf16>
    %cst_168 = arith.constant dense<0.000000e+00> : vector<1x64xf32>
    %188 = tpu.matmul %187, %144, %cst_168 {dimension_numbers = #tpu.dot_dimension_numbers<[1], [0], [0], [1], [0, 0, 1, 1], [], []>} : vector<1x9xbf16>, vector<9x64xbf16>, vector<1x64xf32> -> vector<1x64xf32>
    %189 = arith.truncf %188 : vector<1x64xf32> to vector<1x64xbf16>
    %c5_169 = arith.constant 5 : index
    %c0_170 = arith.constant 0 : index
    %c0_171 = arith.constant 0 : index
    %190 = vector.load %arg8[%c5_169, %c0_170, %c0_171] : memref<9x64x64xbf16, #tpu.memory_space<vmem>>, vector<1x64x64xbf16>
    %191 = vector.shape_cast %190 : vector<1x64x64xbf16> to vector<64x64xbf16>
    %cst_172 = arith.constant dense<0.000000e+00> : vector<1x64xf32>
    %192 = tpu.matmul %189, %191, %cst_172 {dimension_numbers = #tpu.dot_dimension_numbers<[1], [0], [0], [1], [0, 0, 1, 1], [], []>} : vector<1x64xbf16>, vector<64x64xbf16>, vector<1x64xf32> -> vector<1x64xf32>
    %193 = arith.addf %185, %192 : vector<1x64xf32>
    %c6_173 = arith.constant 6 : index
    %c0_174 = arith.constant 0 : index
    %c0_175 = arith.constant 0 : index
    %194 = vector.load %arg7[%c6_173, %c0_174, %c0_175] : memref<9x1x9xbf16, #tpu.memory_space<vmem>>, vector<1x1x9xbf16>
    %195 = vector.shape_cast %194 : vector<1x1x9xbf16> to vector<1x9xbf16>
    %cst_176 = arith.constant dense<0.000000e+00> : vector<1x64xf32>
    %196 = tpu.matmul %195, %144, %cst_176 {dimension_numbers = #tpu.dot_dimension_numbers<[1], [0], [0], [1], [0, 0, 1, 1], [], []>} : vector<1x9xbf16>, vector<9x64xbf16>, vector<1x64xf32> -> vector<1x64xf32>
    %197 = arith.truncf %196 : vector<1x64xf32> to vector<1x64xbf16>
    %c6_177 = arith.constant 6 : index
    %c0_178 = arith.constant 0 : index
    %c0_179 = arith.constant 0 : index
    %198 = vector.load %arg8[%c6_177, %c0_178, %c0_179] : memref<9x64x64xbf16, #tpu.memory_space<vmem>>, vector<1x64x64xbf16>
    %199 = vector.shape_cast %198 : vector<1x64x64xbf16> to vector<64x64xbf16>
    %cst_180 = arith.constant dense<0.000000e+00> : vector<1x64xf32>
    %200 = tpu.matmul %197, %199, %cst_180 {dimension_numbers = #tpu.dot_dimension_numbers<[1], [0], [0], [1], [0, 0, 1, 1], [], []>} : vector<1x64xbf16>, vector<64x64xbf16>, vector<1x64xf32> -> vector<1x64xf32>
    %201 = arith.addf %193, %200 : vector<1x64xf32>
    %c7_181 = arith.constant 7 : index
    %c0_182 = arith.constant 0 : index
    %c0_183 = arith.constant 0 : index
    %202 = vector.load %arg7[%c7_181, %c0_182, %c0_183] : memref<9x1x9xbf16, #tpu.memory_space<vmem>>, vector<1x1x9xbf16>
    %203 = vector.shape_cast %202 : vector<1x1x9xbf16> to vector<1x9xbf16>
    %cst_184 = arith.constant dense<0.000000e+00> : vector<1x64xf32>
    %204 = tpu.matmul %203, %144, %cst_184 {dimension_numbers = #tpu.dot_dimension_numbers<[1], [0], [0], [1], [0, 0, 1, 1], [], []>} : vector<1x9xbf16>, vector<9x64xbf16>, vector<1x64xf32> -> vector<1x64xf32>
    %205 = arith.truncf %204 : vector<1x64xf32> to vector<1x64xbf16>
    %c7_185 = arith.constant 7 : index
    %c0_186 = arith.constant 0 : index
    %c0_187 = arith.constant 0 : index
    %206 = vector.load %arg8[%c7_185, %c0_186, %c0_187] : memref<9x64x64xbf16, #tpu.memory_space<vmem>>, vector<1x64x64xbf16>
    %207 = vector.shape_cast %206 : vector<1x64x64xbf16> to vector<64x64xbf16>
    %cst_188 = arith.constant dense<0.000000e+00> : vector<1x64xf32>
    %208 = tpu.matmul %205, %207, %cst_188 {dimension_numbers = #tpu.dot_dimension_numbers<[1], [0], [0], [1], [0, 0, 1, 1], [], []>} : vector<1x64xbf16>, vector<64x64xbf16>, vector<1x64xf32> -> vector<1x64xf32>
    %209 = arith.addf %201, %208 : vector<1x64xf32>
    %c8_189 = arith.constant 8 : index
    %c0_190 = arith.constant 0 : index
    %c0_191 = arith.constant 0 : index
    %210 = vector.load %arg7[%c8_189, %c0_190, %c0_191] : memref<9x1x9xbf16, #tpu.memory_space<vmem>>, vector<1x1x9xbf16>
    %211 = vector.shape_cast %210 : vector<1x1x9xbf16> to vector<1x9xbf16>
    %cst_192 = arith.constant dense<0.000000e+00> : vector<1x64xf32>
    %212 = tpu.matmul %211, %144, %cst_192 {dimension_numbers = #tpu.dot_dimension_numbers<[1], [0], [0], [1], [0, 0, 1, 1], [], []>} : vector<1x9xbf16>, vector<9x64xbf16>, vector<1x64xf32> -> vector<1x64xf32>
    %213 = arith.truncf %212 : vector<1x64xf32> to vector<1x64xbf16>
    %c8_193 = arith.constant 8 : index
    %c0_194 = arith.constant 0 : index
    %c0_195 = arith.constant 0 : index
    %214 = vector.load %arg8[%c8_193, %c0_194, %c0_195] : memref<9x64x64xbf16, #tpu.memory_space<vmem>>, vector<1x64x64xbf16>
    %215 = vector.shape_cast %214 : vector<1x64x64xbf16> to vector<64x64xbf16>
    %cst_196 = arith.constant dense<0.000000e+00> : vector<1x64xf32>
    %216 = tpu.matmul %213, %215, %cst_196 {dimension_numbers = #tpu.dot_dimension_numbers<[1], [0], [0], [1], [0, 0, 1, 1], [], []>} : vector<1x64xbf16>, vector<64x64xbf16>, vector<1x64xf32> -> vector<1x64xf32>
    %217 = arith.addf %209, %216 : vector<1x64xf32>
    %c0_197 = arith.constant 0 : index
    %c0_198 = arith.constant 0 : index
    %218 = vector.load %arg9[%c0_197, %c0_198] : memref<1x64xf32, #tpu.memory_space<vmem>>, vector<1x64xf32>
    %219 = arith.addf %217, %218 : vector<1x64xf32>
    %cst_199 = arith.constant 0.000000e+00 : f32
    %220 = vector.broadcast %cst_199 : f32 to vector<1x64xf32>
    %221 = arith.maximumf %219, %220 : vector<1x64xf32>
    %222 = arith.truncf %221 : vector<1x64xf32> to vector<1x64xbf16>
    %c0_200 = arith.constant 0 : index
    %c0_201 = arith.constant 0 : index
    %c0_202 = arith.constant 0 : index
    %223 = vector.load %arg10[%c0_200, %c0_201, %c0_202] : memref<1x1x64xbf16, #tpu.memory_space<vmem>>, vector<1x1x64xbf16>
    %224 = vector.shape_cast %223 : vector<1x1x64xbf16> to vector<1x64xbf16>
    %225 = vector.shape_cast %222 : vector<1x64xbf16> to vector<1x1x64xbf16>
    tpu.vector_store %arg10[%c0_200, %c0_201, %c0_202], %225 {strides = array<i32>} : memref<1x1x64xbf16, #tpu.memory_space<vmem>>, vector<1x1x64xbf16>,
    return
  }
  func.func @transform_0(%arg0: i32) -> (i32, i32, i32) {
    %c0_i32 = arith.constant 0 : i32
    %c0_i32_0 = arith.constant 0 : i32
    %c0_i32_1 = arith.constant 0 : i32
    return %arg0, %c0_i32, %c0_i32_0 : i32, i32, i32
  }
  func.func @transform_1(%arg0: i32) -> (i32, i32) {
    %c0_i32 = arith.constant 0 : i32
    %c0_i32_0 = arith.constant 0 : i32
    %c0_i32_1 = arith.constant 0 : i32
    return %c0_i32, %c0_i32_0 : i32, i32
  }
  func.func @transform_2(%arg0: i32) -> (i32, i32) {
    %c0_i32 = arith.constant 0 : i32
    %c0_i32_0 = arith.constant 0 : i32
    %c0_i32_1 = arith.constant 0 : i32
    return %c0_i32, %c0_i32_0 : i32, i32
  }
  func.func @transform_3(%arg0: i32) -> (i32, i32, i32) {
    %c0_i32 = arith.constant 0 : i32
    %c0_i32_0 = arith.constant 0 : i32
    %c0_i32_1 = arith.constant 0 : i32
    %c0_i32_2 = arith.constant 0 : i32
    return %c0_i32, %c0_i32_0, %c0_i32_1 : i32, i32, i32
  }
  func.func @transform_4(%arg0: i32) -> (i32, i32, i32) {
    %c0_i32 = arith.constant 0 : i32
    %c0_i32_0 = arith.constant 0 : i32
    %c0_i32_1 = arith.constant 0 : i32
    %c0_i32_2 = arith.constant 0 : i32
    return %c0_i32, %c0_i32_0, %c0_i32_1 : i32, i32, i32
  }
  func.func @transform_5(%arg0: i32) -> (i32, i32) {
    %c0_i32 = arith.constant 0 : i32
    %c0_i32_0 = arith.constant 0 : i32
    %c0_i32_1 = arith.constant 0 : i32
    return %c0_i32, %c0_i32_0 : i32, i32
  }
  func.func @transform_6(%arg0: i32) -> (i32, i32, i32) {
    %c0_i32 = arith.constant 0 : i32
    %c0_i32_0 = arith.constant 0 : i32
    %c0_i32_1 = arith.constant 0 : i32
    %c0_i32_2 = arith.constant 0 : i32
    return %c0_i32, %c0_i32_0, %c0_i32_1 : i32, i32, i32
  }
  func.func @transform_7(%arg0: i32) -> (i32, i32, i32) {
    %c0_i32 = arith.constant 0 : i32
    %c0_i32_0 = arith.constant 0 : i32
    %c0_i32_1 = arith.constant 0 : i32
    %c0_i32_2 = arith.constant 0 : i32
    return %c0_i32, %c0_i32_0, %c0_i32_1 : i32, i32, i32
  }
  func.func @transform_8(%arg0: i32) -> (i32, i32) {
    %c0_i32 = arith.constant 0 : i32
    %c0_i32_0 = arith.constant 0 : i32
    %c0_i32_1 = arith.constant 0 : i32
    return %c0_i32, %c0_i32_0 : i32, i32
  }
  func.func @transform_9(%arg0: i32) -> (i32, i32, i32) {
    %c0_i32 = arith.constant 0 : i32
    %c0_i32_0 = arith.constant 0 : i32
    %c0_i32_1 = arith.constant 0 : i32
    return %arg0, %c0_i32, %c0_i32_0 : i32, i32, i32
  }
}

</mosaic_0001>

<bundles_post_ra>
// kernel: dqn_forward.3
= control target key start
LH: loop header
LB: loop body
LE: loop exit
PB: predicated region body
PF: predicated region fallthrough
CT: control target
= control target key end

     0   :  { %v753_v1 = vmov 0   ;;  %vm146_vm0 = vcmask 523264   ;;  %v41_v50 = vlaneseq  ;;  %s943_s1 = inlined_call_operand.vmem [shape: bf16[64,512], index: 1, kind: input, shape index: {}]   ;;  %s944_s0 = inlined_call_operand.vmem [shape: bf16[16,64], index: 0, kind: input, shape index: {}]   ;;  %s945_s3 = inlined_call_operand.vmem [shape: bf16[512,128], index: 3, kind: input, shape index: {}]   ;;  %s946_s2 = inlined_call_operand.vmem [shape: f32[1,512], index: 2, kind: input, shape index: {}]   ;;  %s947_s4 = inlined_call_operand.vmem [shape: f32[1,128], index: 4, kind: input, shape index: {}]   ;;  %s948_s5 = inlined_call_operand.vmem [shape: f32[16,128], index: 5, kind: output, shape index: {}]  }
   0x1   :  { %v696_v0 = vld [vmem:[%s943_s1 + $0x4] ss:$16 sps:$4 sm:$0xff]   ;;  %182 = vmatprep.mubr.bf16.mxu0 %v753_v1  ;;  %225 = vmatprep.mubr.bf16.mxu1 %v753_v1  ;;  %v698_v2 = vld [vmem:[%s943_s1 + $0xc] ss:$16 sps:$4 sm:$0xff]   ;;  %v700_v3 = vld [vmem:[%s943_s1] ss:$16 sps:$4 sm:$0xff]  }
   0x2   :  { %150 = vmatprep.subr.bf16.mxu0 %v696_v0  ;;  %v701_v4 = vld [vmem:[%s943_s1 + $0x8] ss:$16 sps:$4 sm:$0xff]   ;;  %193 = vmatprep.subr.bf16.mxu1 %v698_v2  ;;  %v702_v5 = vld [vmem:[%s943_s1 + $0x24] ss:$16 sps:$4 sm:$0xff]   ;;  %v704_v6 = vld [vmem:[%s943_s1 + $0x2c] ss:$16 sps:$4 sm:$0xff]  }
   0x3   :  { %151 = vmatpush1.bf16.msra.mxu0 %v700_v3  ;;  %194 = vmatpush1.bf16.msra.mxu1 %v701_v4  ;;  %v706_v7 = vld [vmem:[%s943_s1 + $0x20] ss:$16 sps:$4 sm:$0xff]   ;;  %v707_v8 = vld [vmem:[%s943_s1 + $0x28] ss:$16 sps:$4 sm:$0xff]   ;;  %v708_v9 = vld [vmem:[%s943_s1 + $0x44] ss:$16 sps:$4 sm:$0xff]  }
   0x4   :  { %152 = vmatprep.subr.bf16.mxu0 %v702_v5  ;;  %195 = vmatprep.subr.bf16.mxu1 %v704_v6  ;;  %v710_v10 = vld [vmem:[%s943_s1 + $0x4c] ss:$16 sps:$4 sm:$0xff]   ;;  %v712_v11 = vld [vmem:[%s943_s1 + $0x40] ss:$16 sps:$4 sm:$0xff]   ;;  %v713_v12 = vld [vmem:[%s943_s1 + $0x48] ss:$16 sps:$4 sm:$0xff]  }
   0x5   :  { %v714_v13 = vld [vmem:[%s943_s1 + $0x64] ss:$16 sps:$4 sm:$0xff]   ;;  %v716_v14 = vld [vmem:[%s943_s1 + $0x6c] ss:$16 sps:$4 sm:$0xff]   ;;  %v718_v15 = vld [vmem:[%s943_s1 + $0x60] ss:$16 sps:$4 sm:$0xff]  }
   0x6   :  { %v719_v16 = vld [vmem:[%s943_s1 + $0x68] ss:$16 sps:$4 sm:$0xff]   ;;  %v721_v17 = vld [vmem:[%s945_s3 + $0x40] sm:$0xff]   ;;  %v729_v26 = vld [vmem:[%s945_s3 + $0x50] sm:$0xff]   ;;  %v42_v51 = vshrl.u32 %v41_v50, 7 }
   0x7   :  { %153 = vmatpush1.bf16.msra.mxu0 %v706_v7  ;;  %196 = vmatpush1.bf16.msra.mxu1 %v707_v8  ;;  %v720_v18 = vld [vmem:[%s944_s0] sm:$0xff]   ;;  %v725_v22 = vld [vmem:[%s945_s3 + $0x48] sm:$0xff]   ;;  %v730_v27 = vld [vmem:[%s945_s3 + $0xd0] sm:$0xff]  }
   0x8   :  { %154 = vmatprep.subr.bf16.mxu0 %v708_v9  ;;  %197 = vmatprep.subr.bf16.mxu1 %v710_v10  ;;  %v722_v19 = vld [vmem:[%s945_s3 + $0xc0] sm:$0xff]   ;;  %v726_v23 = vld [vmem:[%s945_s3 + $0xc8] sm:$0xff]   ;;  %v731_v28 = vld [vmem:[%s945_s3 + $0x10] sm:$0xff]   ;;  %v43_v52 = vsub.s32 0, %v42_v51  ;;  %v51_v53 = vsub.s32 2, %v42_v51  ;;  %v47_v55 = vsub.s32 1, %v42_v51 }
   0x9   :  { %v723_v20 = vld [vmem:[%s945_s3] sm:$0xff]   ;;  %v727_v24 = vld [vmem:[%s945_s3 + $0x8] sm:$0xff]   ;;  %v732_v29 = vld [vmem:[%s945_s3 + $0x90] sm:$0xff]   ;;  %v55_v56 = vsub.s32 3, %v42_v51 }
   0xa   :  { %v724_v21 = vld [vmem:[%s945_s3 + $0x80] sm:$0xff]   ;;  %v728_v25 = vld [vmem:[%s945_s3 + $0x88] sm:$0xff]   ;;  %v733_v30 = vld [vmem:[%s945_s3 + $0x58] sm:$0xff]  }
   0xb   :  { %155 = vmatpush1.bf16.msra.mxu0 %v712_v11  ;;  %198 = vmatpush1.bf16.msra.mxu1 %v713_v12  ;;  %v734_v31 = vld [vmem:[%s945_s3 + $0xd8] sm:$0xff]   ;;  %v737_v34 = vld [vmem:[%s945_s3 + $0x60] sm:$0xff]   ;;  %v741_v38 = vld [vmem:[%s945_s3 + $0x68] sm:$0xff]  }
   0xc   :  { %156 = vmatprep.subr.bf16.mxu0 %v714_v13  ;;  %199 = vmatprep.subr.bf16.mxu1 %v716_v14  ;;  %v735_v32 = vld [vmem:[%s945_s3 + $0x18] sm:$0xff]   ;;  %v738_v35 = vld [vmem:[%s945_s3 + $0xe0] sm:$0xff]   ;;  %v742_v39 = vld [vmem:[%s945_s3 + $0xe8] sm:$0xff]  }
   0xd   :  { %v736_v33 = vld [vmem:[%s945_s3 + $0x98] sm:$0xff]   ;;  %v739_v36 = vld [vmem:[%s945_s3 + $0x20] sm:$0xff]   ;;  %v743_v40 = vld [vmem:[%s945_s3 + $0x28] sm:$0xff]  }
   0xe   :  { %v740_v37 = vld [vmem:[%s945_s3 + $0xa0] sm:$0xff]   ;;  %v744_v41 = vld [vmem:[%s945_s3 + $0xa8] sm:$0xff]   ;;  %v745_v42 = vld [vmem:[%s945_s3 + $0x70] sm:$0xff]  }
   0xf   :  { %157 = vmatpush1.bf16.msra.mxu0 %v718_v15  ;;  %200 = vmatpush1.bf16.msra.mxu1 %v719_v16  ;;  %v746_v43 = vld [vmem:[%s945_s3 + $0xf0] sm:$0xff]   ;;  %v749_v46 = vld [vmem:[%s945_s3 + $0x78] sm:$0xff]   ;;  %v39_v54 = vld [vmem:[%s946_s2] sm:$0xf] }
  0x10   :  { %651 = vmatprep.subr.bf16.mxu0 %v721_v17  ;;  %673 = vmatprep.subr.bf16.mxu1 %v722_v19  ;;  %v747_v44 = vld [vmem:[%s945_s3 + $0x30] sm:$0xff]   ;;  %v750_v47 = vld [vmem:[%s945_s3 + $0xf8] sm:$0xff]   ;;  %v44_v57 = vrot.slane %v39_v54, %v43_v52  ;;  %v52_v58 = vrot.slane %v39_v54, %v51_v53  ;;  %v48_v59 = vrot.slane %v39_v54, %v47_v55 }
  0x11   :  { %v748_v45 = vld [vmem:[%s945_s3 + $0xb0] sm:$0xff]   ;;  %v751_v48 = vld [vmem:[%s945_s3 + $0x38] sm:$0xff]   ;;  %v56_v60 = vrot.slane %v39_v54, %v55_v56 }
  0x12   :  { %616 = vmatmul.mubr.msk.bf16.vlgmr.msra.gmra.mrb[0].mxu0 %vm146_vm0, %v720_v18  ;;  %617 = vmatmul.mubr.msk.bf16.vlgmr.msra.gmra.mrb[0].mxu1 %vm146_vm0, %v720_v18  ;;  %v752_v49 = vld [vmem:[%s945_s3 + $0xb8] sm:$0xff]  }
  0x13   :  { %652 = vmatpush3.bf16.msra.mxu0 %v723_v20  ;;  %674 = vmatpush3.bf16.msra.mxu1 %v724_v21 }
  0x14   :  { %653 = vmatprep.subr.bf16.mxu0 %v725_v22  ;;  %675 = vmatprep.subr.bf16.mxu1 %v726_v23 }
  0x17   :  { %654 = vmatpush3.bf16.msra.mxu0 %v727_v24  ;;  %676 = vmatpush3.bf16.msra.mxu1 %v728_v25 }
  0x18   :  { %655 = vmatprep.subr.bf16.mxu0 %v729_v26  ;;  %677 = vmatprep.subr.bf16.mxu1 %v730_v27  ;;  %v618_v27 = vld [vmem:[%s947_s4] ss:$0 sm:$0xff] }
  0x1b   :  { %656 = vmatpush3.bf16.msra.mxu0 %v731_v28  ;;  %678 = vmatpush3.bf16.msra.mxu1 %v732_v29 }
  0x1c   :  { %657 = vmatprep.subr.bf16.mxu0 %v733_v30  ;;  %679 = vmatprep.subr.bf16.mxu1 %v734_v31 }
  0x1f   :  { %658 = vmatpush3.bf16.msra.mxu0 %v735_v32  ;;  %680 = vmatpush3.bf16.msra.mxu1 %v736_v33 }
  0x20   :  { %659 = vmatprep.subr.bf16.mxu0 %v737_v34  ;;  %681 = vmatprep.subr.bf16.mxu1 %v738_v35 }
  0x23   :  { %660 = vmatpush3.bf16.msra.mxu0 %v739_v36  ;;  %682 = vmatpush3.bf16.msra.mxu1 %v740_v37 }
  0x24   :  { %661 = vmatprep.subr.bf16.mxu0 %v741_v38  ;;  %683 = vmatprep.subr.bf16.mxu1 %v742_v39 }
  0x27   :  { %662 = vmatpush3.bf16.msra.mxu0 %v743_v40  ;;  %684 = vmatpush3.bf16.msra.mxu1 %v744_v41 }
  0x28   :  { %663 = vmatprep.subr.bf16.mxu0 %v745_v42  ;;  %685 = vmatprep.subr.bf16.mxu1 %v746_v43 }
  0x2b   :  { %664 = vmatpush3.bf16.msra.mxu0 %v747_v44  ;;  %686 = vmatpush3.bf16.msra.mxu1 %v748_v45 }
  0x2c   :  { %665 = vmatprep.subr.bf16.mxu0 %v749_v46  ;;  %687 = vmatprep.subr.bf16.mxu1 %v750_v47 }
  0x2f   :  { %666 = vmatpush3.bf16.msra.mxu0 %v751_v48  ;;  %688 = vmatpush3.bf16.msra.mxu1 %v752_v49 }
  0xe5   :  { %v184_v61 = vpop.f32.mrb[0].mxu0  ;;  %v227_v62 = vpop.f32.mrb[0].mxu1 }
  0xe6   :  { %v185_v63 = vadd.f32 %v184_v61, %v44_v57  ;;  %v228_v0 = vadd.f32 %v227_v62, %v52_v58  ;;  %v186_v1 = vpop.f32.mrb[1].mxu0  ;;  %v229_v2 = vpop.f32.mrb[1].mxu1 }
  0xe7   :  { %v187_v3 = vadd.f32 %v186_v1, %v48_v59  ;;  %v230_v4 = vadd.f32 %v229_v2, %v56_v60  ;;  %v188_v5 = vpop.f32.mrb[2].mxu0  ;;  %v231_v6 = vpop.f32.mrb[2].mxu1 }
  0xe8   :  { %v238_v7 = vmax.f32 %v228_v0, 0.0  ;;  %v189_v8 = vadd.f32 %v188_v5, %v44_v57  ;;  %v232_v9 = vadd.f32 %v231_v6, %v52_v58  ;;  %v190_v10 = vpop.f32.mrb[3].mxu0  ;;  %v233_v11 = vpop.f32.mrb[3].mxu1  ;;  %v236_v15 = vmax.f32 %v185_v63, 0.0 }
  0xe9   :  { %v239_v12 = vmax.f32 %v230_v4, 0.0  ;;  %v191_v13 = vadd.f32 %v190_v10, %v48_v59  ;;  %v234_v14 = vadd.f32 %v233_v11, %v56_v60  ;;  %v237_v18 = vmax.f32 %v187_v3, 0.0 }
  0xea   :  { %v240_v16 = vmax.f32 %v189_v8, 0.0  ;;  %v242_v17 = vmax.f32 %v232_v9, 0.0 }
  0xeb   :  { %v241_v19 = vmax.f32 %v191_v13, 0.0  ;;  %v243_v20 = vmax.f32 %v234_v14, 0.0 }
  0xec   :  { %v244_v21 = vpack.c.bf16 %v240_v16, %v236_v15  ;;  %v246_v22 = vpack.c.bf16 %v242_v17, %v238_v7 }
  0xed   :  { %v245_v23 = vpack.c.bf16 %v241_v19, %v237_v18  ;;  %v247_v24 = vpack.c.bf16 %v243_v20, %v239_v12 }
  0xef   :  { %543 = vmatprep.mubr.bf16.mxu0 %v245_v23  ;;  %584 = vmatprep.mubr.bf16.mxu1 %v247_v24 }
  0xf0   :  { %544 = vmatmul.mubr.bf16.vlgmr.msra.gmra.mrb[4].mxu0 %v244_v21  ;;  %585 = vmatmul.mubr.bf16.vlgmr.msra.gmra.mrb[4].mxu1 %v246_v22 }
 0x1c3   :  { %v667_v25 = vpop.f32.mrb[4].mxu0  ;;  %v689_v26 = vpop.f32.mrb[4].mxu1 }
 0x1c4   :  { %v668_v28 = vpop.f32.mrb[5].mxu0  ;;  %v690_v29 = vpop.f32.mrb[5].mxu1 }
 0x1c5   :  { %v669_v30 = vadd.f32 %v668_v28, %v667_v25  ;;  %v691_v31 = vadd.f32 %v690_v29, %v689_v26  ;;  %v670_v32 = vpop.f32.mrb[6].mxu0  ;;  %v692_v33 = vpop.f32.mrb[6].mxu1 }
 0x1c6   :  { %v671_v34 = vpop.f32.mrb[7].mxu0  ;;  %v693_v35 = vpop.f32.mrb[7].mxu1 }
 0x1c7   :  { %v546_v36 = vadd.f32 %v669_v30, %v618_v27  ;;  %v672_v37 = vadd.f32 %v671_v34, %v670_v32  ;;  %v694_v38 = vadd.f32 %v693_v35, %v692_v33 }
 0x1c9   :  { %v587_v39 = vadd.f32 %v691_v31, %v546_v36  ;;  %v549_v40 = vadd.f32 %v672_v37, %v618_v27 }
 0x1cb   :  { %593 = vst [vmem:[%s948_s5] sm:$0xff] %v587_v39  ;;  %v590_v41 = vadd.f32 %v694_v38, %v549_v40 }
 0x1cd   :  { %594 = vst [vmem:[%s948_s5 + $0x8] sm:$0xff] %v590_v41 }

// kernel: dqn_forward.2
= control target key start
LH: loop header
LB: loop body
LE: loop exit
PB: predicated region body
PF: predicated region fallthrough
CT: control target
= control target key end

     0   :  { %s4851_s30 = smov 0   ;;  %s5592_s0 = inlined_call_operand.vmem [shape: bf16[2,64,256], index: 0, kind: input, shape index: {}]   ;;  %s5593_s1 = inlined_call_operand.vmem [shape: bf16[256,32], index: 1, kind: input, shape index: {}]   ;;  %s5594_s2 = inlined_call_operand.vmem [shape: f32[1,32], index: 2, kind: input, shape index: {}]   ;;  %s5595_s3 = inlined_call_operand.vmem [shape: bf16[16,9,64], index: 3, kind: input, shape index: {}]   ;;  %s5596_s4 = inlined_call_operand.vmem [shape: bf16[16,32,64], index: 4, kind: input, shape index: {}]   ;;  %s5597_s5 = inlined_call_operand.vmem [shape: f32[1,64], index: 5, kind: input, shape index: {}]   ;;  %s5598_s6 = inlined_call_operand.vmem [shape: bf16[9,1,9], index: 6, kind: input, shape index: {}]   ;;  %s5599_s7 = inlined_call_operand.vmem [shape: bf16[9,64,64], index: 7, kind: input, shape index: {}]   ;;  %s5600_s8 = inlined_call_operand.vmem [shape: f32[1,64], index: 8, kind: input, shape index: {}]   ;;  %s5601_s9 = inlined_call_operand.vmem [shape: bf16[2,1,64], index: 9, kind: output, shape index: {}]  }
   0x1 LB: > { %s3622_s10 = sadd.s32 4294967295, %s4796_s30   ;;  %p3626_p0 = scmp.ge.s32.totalorder %s4796_s30, 1  ;;  %s4796_s30 = sphi %s4851_s30, %s19_s30  }
   0x2   : > { %p287_p1 = scmp.lt.s32.totalorder %s4796_s30, 3 }
   0x4   : > { %p288_p2 = pnand %p3626_p0, %p287_p1 }
   0x5   : > { %v4678_v0 = vld [vmem:[%s5593_s1 + $0x40] sm:$0xff] (!%p288_p2)   ;;  %v4680_v2 = vld [vmem:[%s5593_s1 + $0x48] sm:$0xff] (!%p288_p2)   ;;  %p321_p3 = scmp.lt.s32.totalorder (!%p288_p2), %s3622_s10, 1  ;;  %v4682_v4 = vld [vmem:[%s5593_s1 + $0x50] sm:$0xff] (!%p288_p2)   ;;  %v4798_v24 = vmov (!%p288_p2), 0.0   ;;  %vm4799_vm0 = vmmov (!%p288_p2), 0  }
   0x6   : > { %291 = sbr.rel (%p288_p2) target bundleno = 5103 (0x13ef), region = 56  ;;  %v4679_v1 = vld [vmem:[%s5593_s1] sm:$0xff] (!%p288_p2)   ;;  %3954 = vmatprep.subr.bf16.mxu0 (!%p288_p2), %v4678_v0  ;;  %v4681_v3 = vld [vmem:[%s5593_s1 + $0x8] sm:$0xff] (!%p288_p2)   ;;  %v4683_v5 = vld [vmem:[%s5593_s1 + $0x10] sm:$0xff] (!%p288_p2)   ;;  %4185 = vmatprep.subr.bf16.mxu1 (!%p288_p2), %v4798_v24  ;;  %vm597_vm1 = vcmask (!%p288_p2), 523264   ;;  %vm717_vm2 = vcmask (!%p288_p2), 261120  }
   0x7   : > { %3955 = vmatpush3.bf16.msra.mxu0 (!%p288_p2), %v4679_v1  ;;  %v4684_v6 = vld [vmem:[%s5593_s1 + $0x58] sm:$0xff] (!%p288_p2)   ;;  %v4686_v8 = vld [vmem:[%s5593_s1 + $0x60] sm:$0xff] (!%p288_p2)   ;;  %v4688_v10 = vld [vmem:[%s5593_s1 + $0x68] sm:$0xff] (!%p288_p2)   ;;  %4193 = vmatprep.mubr.msk.bf16.mxu1 (!%p288_p2), %vm4799_vm0, %v4798_v24  ;;  %vm2459_vm3 = vcmask (!%p288_p2), 1043456   ;;  %vm2460_vm4 = vcmask (!%p288_p2), 1044480   ;;  %vm2455_vm5 = vcmask (!%p288_p2), 72704  }
   0x8   : > { %3956 = vmatprep.subr.bf16.mxu0 (!%p288_p2), %v4680_v2  ;;  %v4685_v7 = vld [vmem:[%s5593_s1 + $0x18] sm:$0xff] (!%p288_p2)   ;;  %v4687_v9 = vld [vmem:[%s5593_s1 + $0x20] sm:$0xff] (!%p288_p2)   ;;  %v4689_v12 = vld [vmem:[%s5593_s1 + $0x28] sm:$0xff] (!%p288_p2)   ;;  %vm3569_vm6 = vcmask (!%p288_p2), 516096   ;;  %vm3570_vm7 = vsmask.f32 (!%p288_p2), 256 }
   0x9   : > { %v4690_v13 = vld [vmem:[%s5593_s1 + $0x70] sm:$0xff] (!%p288_p2)   ;;  %v4692_v15 = vld [vmem:[%s5593_s1 + $0x78] sm:$0xff] (!%p288_p2)   ;;  %v3629_v26 = vld [vmem:[%s5594_s2] ss:$0 sm:$0xff] (!%p288_p2) }
   0xa   : > { %v4691_v14 = vld [vmem:[%s5593_s1 + $0x30] sm:$0xff] (!%p288_p2)   ;;  %v4693_v16 = vld [vmem:[%s5593_s1 + $0x38] sm:$0xff] (!%p288_p2)   ;;  %vm3571_vm8 = vmand (!%p288_p2), %vm3569_vm6, %vm3570_vm7 }
   0xb   : > { %3957 = vmatpush3.bf16.msra.mxu0 (!%p288_p2), %v4681_v3 }
   0xc   : > { %3958 = vmatprep.subr.bf16.mxu0 (!%p288_p2), %v4682_v4 }
   0xd   : > { %s5603_s10 = smov (!%p321_p3, %s3622_s10), 1 }
   0xe   : > { %s3953_s27 = sshll.u32 %s5603_s10, 6 }
   0xf   : > { %3959 = vmatpush3.bf16.msra.mxu0 %v4683_v5  ;;  %s4892_s13 = scalar_lea.vmem %s5592_s0, %s3953_s27 }
  0x10   : > { %3960 = vmatprep.subr.bf16.mxu0 %v4684_v6  ;;  %v4696_v11 = vld [vmem:[%s4892_s13 + $0x4] ss:$8 sps:$4 sm:$0xff]   ;;  %v4694_v17 = vld [vmem:[%s4892_s13] ss:$8 sps:$4 sm:$0xff]   ;;  %v4697_v18 = vld [vmem:[%s4892_s13 + $0x14] ss:$8 sps:$4 sm:$0xff]  }
  0x11   : > { %545 = vmatprep.mubr.bf16.mxu0 %v4696_v11  ;;  %v4699_v19 = vld [vmem:[%s4892_s13 + $0x10] ss:$8 sps:$4 sm:$0xff]   ;;  %v4700_v20 = vld [vmem:[%s4892_s13 + $0x24] ss:$8 sps:$4 sm:$0xff]   ;;  %v4702_v21 = vld [vmem:[%s4892_s13 + $0x20] ss:$8 sps:$4 sm:$0xff]  }
  0x12   : > { %v4703_v22 = vld [vmem:[%s4892_s13 + $0x34] ss:$8 sps:$4 sm:$0xff]   ;;  %v4705_v23 = vld [vmem:[%s4892_s13 + $0x30] ss:$8 sps:$4 sm:$0xff]   ;;  %v4706_v6 = vld [vmem:[%s5595_s3] sm:$0x1f]   ;;  %s328_s13 = scalar_lea.vmem %s5601_s9, %s5603_s10 }
  0x13   : > { %3961 = vmatpush3.bf16.msra.mxu0 %v4685_v7  ;;  %v4708_v7 = vld [vmem:[%s5595_s3 + $0x10] sm:$0x1f]  }
  0x14   : > { %3962 = vmatprep.subr.bf16.mxu0 %v4686_v8  ;;  %v4707_v8 = vld [vmem:[%s5595_s3 + $0x8] sm:$0x1f]  }
  0x17   : > { %3963 = vmatpush3.bf16.msra.mxu0 %v4687_v9  ;;  %v4709_v9 = vld [vmem:[%s5596_s4 + $0x10] sm:$0xff]  }
  0x18   : > { %3964 = vmatprep.subr.bf16.mxu0 %v4688_v10  ;;  %v4710_v10 = vld [vmem:[%s5596_s4 + $0x18] sm:$0xff]  }
  0x1b   : > { %3965 = vmatpush3.bf16.msra.mxu0 %v4689_v12 }
  0x1c   : > { %3966 = vmatprep.subr.bf16.mxu0 %v4690_v13 }
  0x1f   : > { %3967 = vmatpush3.bf16.msra.mxu0 %v4691_v14 }
  0x20   : > { %3968 = vmatprep.subr.bf16.mxu0 %v4692_v15 }
  0x23   : > { %3969 = vmatpush3.bf16.msra.mxu0 %v4693_v16 }
  0x24   : > { %4225 = vmatprep.subr.bf16.mxu0 %v4798_v24 }
  0x26   : > { %546 = vmatmul.mubr.bf16.vlgmr.msra.gmra.mrb[0].mxu0 %v4694_v17 }
  0x27   : > { %553 = vmatprep.mubr.bf16.mxu0 %v4697_v18 }
  0x2e   : > { %554 = vmatmul.mubr.bf16.gmra.mrb[4].mxu0 %v4699_v19 }
  0x2f   : > { %561 = vmatprep.mubr.bf16.mxu0 %v4700_v20 }
  0x36   : > { %562 = vmatmul.mubr.bf16.gmra.mrb[8].mxu0 %v4702_v21 }
  0x37   : > { %569 = vmatprep.mubr.bf16.mxu0 %v4703_v22 }
  0x3e   : > { %570 = vmatmul.mubr.bf16.gmra.mrb[12].mxu0 %v4705_v23 }
  0x3f   : > { %4233 = vmatprep.mubr.msk.bf16.mxu0 %vm4799_vm0, %v4798_v24 }
  0xf9   : > { %v3970_v25 = vpop.f32.mrb[0].mxu0 }
  0xfa   : > { %v3971_v27 = vpop.f32.mrb[1].mxu0 }
  0xfb   : > { %v3972_v28 = vadd.f32 %v3971_v27, %v3970_v25  ;;  %v3973_v29 = vpop.f32.mrb[2].mxu0  ;;  %v4711_v25 = vld [vmem:[%s5596_s4] sm:$0xff]  }
  0xfc   : > { %v3974_v30 = vpop.f32.mrb[3].mxu0 }
  0xfd   : > { %v548_v31 = vadd.f32 %v3972_v28, %v3629_v26  ;;  %v3975_v32 = vadd.f32 %v3974_v30, %v3973_v29  ;;  %v4712_v28 = vld [vmem:[%s5596_s4 + $0x8] sm:$0xff]   ;;  %v4713_v29 = vld [vmem:[%s5596_s4 + $0x20] sm:$0xff]  }
  0xfe   : > { %v4714_v30 = vld [vmem:[%s5596_s4 + $0x28] sm:$0xff]  }
  0xff   : > { %v551_v33 = vadd.f32 %v3975_v32, %v3629_v26  ;;  %v578_v34 = vmax.f32 %v548_v31, 0.0  ;;  %v4715_v31 = vld [vmem:[%s5595_s3 + $0x18] sm:$0x1f]   ;;  %v4716_v32 = vld [vmem:[%s5596_s4 + $0x30] sm:$0xff]  }
 0x101   : > { %v579_v35 = vmax.f32 %v551_v33, 0.0  ;;  %v3976_v36 = vpop.f32.mrb[4].mxu0  ;;  %v4717_v33 = vld [vmem:[%s5596_s4 + $0x38] sm:$0xff]  }
 0x102   : > { %v3977_v37 = vpop.f32.mrb[5].mxu0 }
 0x103   : > { %v4932_v38 = vpack.c.bf16 %v579_v35, %v578_v34  ;;  %v3978_v39 = vadd.f32 %v3977_v37, %v3976_v36  ;;  %v3979_v40 = vpop.f32.mrb[6].mxu0 }
 0x104   : > { %v3980_v41 = vpop.f32.mrb[7].mxu0 }
 0x105   : > { %v556_v42 = vadd.f32 %v3978_v39, %v3629_v26  ;;  %v3981_v43 = vadd.f32 %v3980_v41, %v3979_v40  ;;  %4186 = vmatpush3.bf16.msra.mxu1 %v4932_v38  ;;  %4226 = vmatpush3.bf16.msra.mxu0 %v4932_v38 }
 0x106   : > { %4187 = vmatprep.subr.bf16.mxu1 %v4798_v24  ;;  %4227 = vmatprep.subr.bf16.mxu0 %v4798_v24 }
 0x107   : > { %v559_v44 = vadd.f32 %v3981_v43, %v3629_v26  ;;  %v580_v45 = vmax.f32 %v556_v42, 0.0 }
 0x109   : > { %v581_v46 = vmax.f32 %v559_v44, 0.0  ;;  %v3982_v47 = vpop.f32.mrb[8].mxu0 }
 0x10a   : > { %v3983_v48 = vpop.f32.mrb[9].mxu0 }
 0x10b   : > { %v4938_v49 = vpack.c.bf16 %v581_v46, %v580_v45  ;;  %v3984_v50 = vadd.f32 %v3983_v48, %v3982_v47  ;;  %v3985_v51 = vpop.f32.mrb[10].mxu0 }
 0x10c   : > { %v3986_v52 = vpop.f32.mrb[11].mxu0 }
 0x10d   : > { %v564_v53 = vadd.f32 %v3984_v50, %v3629_v26  ;;  %v3987_v54 = vadd.f32 %v3986_v52, %v3985_v51  ;;  %4188 = vmatpush3.bf16.msra.mxu1 %v4938_v49  ;;  %4228 = vmatpush3.bf16.msra.mxu0 %v4938_v49 }
 0x10e   : > { %4189 = vmatprep.subr.bf16.mxu1 %v4798_v24  ;;  %4229 = vmatprep.subr.bf16.mxu0 %v4798_v24 }
 0x10f   : > { %v567_v55 = vadd.f32 %v3987_v54, %v3629_v26  ;;  %v582_v56 = vmax.f32 %v564_v53, 0.0 }
 0x111   : > { %v583_v57 = vmax.f32 %v567_v55, 0.0  ;;  %v3988_v58 = vpop.f32.mrb[12].mxu0 }
 0x112   : > { %v3989_v59 = vpop.f32.mrb[13].mxu0 }
 0x113   : > { %v4944_v60 = vpack.c.bf16 %v583_v57, %v582_v56  ;;  %v3990_v61 = vadd.f32 %v3989_v59, %v3988_v58  ;;  %v3991_v62 = vpop.f32.mrb[14].mxu0  ;;  %v4718_v57 = vld [vmem:[%s5595_s3 + $0x20] sm:$0x1f]   ;;  %v4720_v59 = vld [vmem:[%s5596_s4 + $0x48] sm:$0xff]  }
 0x114   : > { %v3992_v63 = vpop.f32.mrb[15].mxu0  ;;  %v4719_v58 = vld [vmem:[%s5596_s4 + $0x40] sm:$0xff]  }
 0x115   : > { %v572_v0 = vadd.f32 %v3990_v61, %v3629_v26  ;;  %v3993_v1 = vadd.f32 %v3992_v63, %v3991_v62  ;;  %4190 = vmatpush3.bf16.msra.mxu1 %v4944_v60  ;;  %4230 = vmatpush3.bf16.msra.mxu0 %v4944_v60 }
 0x116   : > { %4191 = vmatprep.subr.bf16.mxu1 %v4798_v24  ;;  %4231 = vmatprep.subr.bf16.mxu0 %v4798_v24 }
 0x117   : > { %v575_v2 = vadd.f32 %v3993_v1, %v3629_v26  ;;  %v584_v3 = vmax.f32 %v572_v0, 0.0 }
 0x119   : > { %v585_v4 = vmax.f32 %v575_v2, 0.0 }
 0x11b   : > { %v4950_v5 = vpack.c.bf16 %v585_v4, %v584_v3 }
 0x11d   : > { %4192 = vmatpush3.bf16.msra.mxu1 %v4950_v5  ;;  %4232 = vmatpush3.bf16.msra.mxu0 %v4950_v5 }
 0x11e   : > { %4197 = vmatprep.subr.bf16.mxu1 %v4798_v24  ;;  %4257 = vmatprep.subr.bf16.mxu0 %v4798_v24 }
 0x120   : > { %4194 = vmatmul.mubr.msk.bf16.vlgmr.msra.gmra.mrb[0].mxu1 %vm597_vm1, %v4706_v6  ;;  %4234 = vmatmul.mubr.msk.bf16.vlgmr.msra.gmra.mrb[16].mxu0 %vm597_vm1, %v4708_v7 }
 0x121   : > { %4198 = vmatpush3.bf16.msra.mxu1 %v4932_v38  ;;  %4205 = vmatprep.mubr.msk.bf16.mxu1 %vm4799_vm0, %v4798_v24 }
 0x122   : > { %4199 = vmatprep.subr.bf16.mxu1 %v4798_v24  ;;  %4261 = vmatprep.mubr.msk.bf16.mxu0 %vm4799_vm0, %v4798_v24 }
 0x123   : > { %4258 = vmatpush3.bf16.msra.mxu0 %v4716_v32 }
 0x124   : > { %4259 = vmatprep.subr.bf16.mxu0 %v4798_v24 }
 0x125   : > { %4200 = vmatpush3.bf16.msra.mxu1 %v4938_v49 }
 0x126   : > { %4201 = vmatprep.subr.bf16.mxu1 %v4798_v24 }
 0x127   : > { %4260 = vmatpush3.bf16.msra.mxu0 %v4717_v33 }
 0x128   : > { %4265 = vmatprep.subr.bf16.mxu0 %v4798_v24 }
 0x129   : > { %4202 = vmatpush3.bf16.msra.mxu1 %v4944_v60 }
 0x12a   : > { %4203 = vmatprep.subr.bf16.mxu1 %v4798_v24 }
 0x12d   : > { %4204 = vmatpush3.bf16.msra.mxu1 %v4950_v5 }
 0x12e   : > { %4209 = vmatprep.subr.bf16.mxu1 %v4798_v24 }
 0x130   : > { %4206 = vmatmul.mubr.msk.bf16.vlgmr.msra.gmra.mrb[4].mxu1 %vm597_vm1, %v4707_v8 }
 0x131   : > { %4213 = vmatprep.mubr.msk.bf16.mxu1 %vm4799_vm0, %v4798_v24  ;;  %4210 = vmatpush3.bf16.msra.mxu1 %v4709_v9  ;;  %v4721_v9 = vld [vmem:[%s5595_s3 + $0x28] sm:$0x1f]  }
 0x132   : > { %4211 = vmatprep.subr.bf16.mxu1 %v4798_v24 }
 0x135   : > { %4212 = vmatpush3.bf16.msra.mxu1 %v4710_v10  ;;  %v4722_v10 = vld [vmem:[%s5596_s4 + $0x50] sm:$0xff]  }
 0x136   : > { %4217 = vmatprep.subr.bf16.mxu1 %v4798_v24 }
 0x1f3   : > { %v635_v11 = vpop.f32.mrb[0].mxu1  ;;  %v863_v12 = vpop.f32.mrb[16].mxu0 }
 0x1f4   : > { %v4195_v13 = vpop.f32.mrb[1].mxu1  ;;  %v4235_v14 = vpop.f32.mrb[17].mxu0 }
 0x1f5   : > { %v638_v15 = vpop.f32.mrb[2].mxu1  ;;  %v866_v16 = vpop.f32.mrb[18].mxu0 }
 0x1f6   : > { %v642_v17 = vpack.c.bf16 %v638_v15, %v635_v11  ;;  %v4196_v18 = vpop.f32.mrb[3].mxu1  ;;  %v870_v19 = vpack.c.bf16 %v866_v16, %v863_v12  ;;  %v4236_v20 = vpop.f32.mrb[19].mxu0  ;;  %v4723_v11 = vld [vmem:[%s5596_s4 + $0x58] sm:$0xff]  }
 0x203   : > { %v692_v21 = vpop.f32.mrb[4].mxu1 }
 0x204   : > { %v4207_v22 = vpop.f32.mrb[5].mxu1 }
 0x205   : > { %v695_v23 = vpop.f32.mrb[6].mxu1 }
 0x206   : > { %v699_v26 = vpack.c.bf16 %v695_v23, %v692_v21  ;;  %v4208_v27 = vpop.f32.mrb[7].mxu1  ;;  %v4724_v23 = vld [vmem:[%s5595_s3 + $0x30] sm:$0x1f]  }
 0x208   : > { %4214 = vmatmul.mubr.msk.bf16.vlgmr.msra.gmra.mrb[8].mxu1 %vm717_vm2, %v699_v26  ;;  %v4726_v26 = vld [vmem:[%s5596_s4 + $0x68] sm:$0xff]  }
 0x209   : > { %4218 = vmatpush3.bf16.msra.mxu1 %v4711_v25  ;;  %4221 = vmatprep.mubr.msk.bf16.mxu1 %vm4799_vm0, %v4798_v24  ;;  %v4725_v25 = vld [vmem:[%s5596_s4 + $0x60] sm:$0xff]  }
 0x20a   : > { %4219 = vmatprep.subr.bf16.mxu1 %v4798_v24 }
 0x20d   : > { %4220 = vmatpush3.bf16.msra.mxu1 %v4712_v28 }
 0x20e   : > { %4237 = vmatprep.subr.bf16.mxu1 %v4798_v24 }
 0x210   : > { %4222 = vmatmul.mubr.msk.bf16.vlgmr.msra.gmra.mrb[12].mxu1 %vm717_vm2, %v642_v17 }
 0x211   : > { %4238 = vmatpush3.bf16.msra.mxu1 %v4713_v29  ;;  %4241 = vmatprep.mubr.msk.bf16.mxu1 %vm4799_vm0, %v4798_v24 }
 0x212   : > { %4239 = vmatprep.subr.bf16.mxu1 %v4798_v24 }
 0x215   : > { %4240 = vmatpush3.bf16.msra.mxu1 %v4714_v30 }
 0x216   : > { %4245 = vmatprep.subr.bf16.mxu1 %v4798_v24 }
 0x218   : > { %4242 = vmatmul.mubr.msk.bf16.vlgmr.msra.gmra.mrb[16].mxu1 %vm717_vm2, %v870_v19 }
 0x219   : > { %4246 = vmatpush3.bf16.msra.mxu1 %v4932_v38  ;;  %4253 = vmatprep.mubr.msk.bf16.mxu1 %vm4799_vm0, %v4798_v24 }
 0x21a   : > { %4247 = vmatprep.subr.bf16.mxu1 %v4798_v24 }
 0x21d   : > { %4248 = vmatpush3.bf16.msra.mxu1 %v4938_v49 }
 0x21e   : > { %4249 = vmatprep.subr.bf16.mxu1 %v4798_v24 }
 0x221   : > { %4250 = vmatpush3.bf16.msra.mxu1 %v4944_v60 }
 0x222   : > { %4251 = vmatprep.subr.bf16.mxu1 %v4798_v24 }
 0x225   : > { %4252 = vmatpush3.bf16.msra.mxu1 %v4950_v5 }
 0x226   : > { %4277 = vmatprep.subr.bf16.mxu1 %v4798_v24 }
 0x228   : > { %4254 = vmatmul.mubr.msk.bf16.vlgmr.msra.gmra.mrb[20].mxu1 %vm597_vm1, %v4715_v31 }
 0x229   : > { %4281 = vmatprep.mubr.msk.bf16.mxu1 %vm4799_vm0, %v4798_v24  ;;  %4278 = vmatpush3.bf16.msra.mxu1 %v4719_v58 }
 0x22a   : > { %4279 = vmatprep.subr.bf16.mxu1 %v4798_v24 }
 0x22d   : > { %4280 = vmatpush3.bf16.msra.mxu1 %v4720_v59 }
 0x22e   : > { %4285 = vmatprep.subr.bf16.mxu1 %v4798_v24 }
 0x2db   : > { %v755_v34 = vpop.f32.mrb[8].mxu1 }
 0x2dc   : > { %v4215_v35 = vpop.f32.mrb[9].mxu1 }
 0x2dd   : > { %v758_v36 = vpop.f32.mrb[10].mxu1 }
 0x2de   : > { %v4216_v37 = vpop.f32.mrb[11].mxu1 }
 0x2e3   : > { %v811_v39 = vpop.f32.mrb[12].mxu1 }
 0x2e4   : > { %v812_v40 = vadd.f32 %v811_v39, %v755_v34  ;;  %v4223_v41 = vpop.f32.mrb[13].mxu1  ;;  %v4727_v39 = vld [vmem:[%s5595_s3 + $0x38] sm:$0x1f]  }
 0x2e5   : > { %v814_v42 = vpop.f32.mrb[14].mxu1  ;;  %v4729_v41 = vld [vmem:[%s5596_s4 + $0x78] sm:$0xff]  }
 0x2e6   : > { %v815_v43 = vadd.f32 %v814_v42, %v758_v36  ;;  %v4224_v44 = vpop.f32.mrb[15].mxu1 }
 0x2eb   : > { %v925_v45 = vpop.f32.mrb[16].mxu1 }
 0x2ec   : > { %v932_v46 = vadd.f32 %v925_v45, %v812_v40  ;;  %v4243_v47 = vpop.f32.mrb[17].mxu1  ;;  %v4728_v40 = vld [vmem:[%s5596_s4 + $0x70] sm:$0xff]  }
 0x2ed   : > { %v928_v48 = vpop.f32.mrb[18].mxu1 }
 0x2ee   : > { %v933_v50 = vadd.f32 %v928_v48, %v815_v43  ;;  %v4244_v51 = vpop.f32.mrb[19].mxu1 }
 0x2fb   : > { %v979_v52 = vpop.f32.mrb[20].mxu1 }
 0x2fc   : > { %v4255_v53 = vpop.f32.mrb[21].mxu1 }
 0x2fd   : > { %v982_v54 = vpop.f32.mrb[22].mxu1 }
 0x2fe   : > { %v986_v55 = vpack.c.bf16 %v982_v54, %v979_v52  ;;  %v4256_v56 = vpop.f32.mrb[23].mxu1  ;;  %v4730_v54 = vld [vmem:[%s5595_s3 + $0x40] sm:$0x1f]  }
 0x2ff   : > { %v4732_v56 = vld [vmem:[%s5596_s4 + $0x88] sm:$0xff]  }
 0x300   : > { %4262 = vmatmul.mubr.msk.bf16.vlgmr.msra.gmra.mrb[20].mxu0 %vm717_vm2, %v986_v55  ;;  %v4731_v55 = vld [vmem:[%s5596_s4 + $0x80] sm:$0xff]  }
 0x301   : > { %4266 = vmatpush3.bf16.msra.mxu0 %v4932_v38  ;;  %4273 = vmatprep.mubr.msk.bf16.mxu0 %vm4799_vm0, %v4798_v24 }
 0x302   : > { %4267 = vmatprep.subr.bf16.mxu0 %v4798_v24 }
 0x305   : > { %4268 = vmatpush3.bf16.msra.mxu0 %v4938_v49 }
 0x306   : > { %4269 = vmatprep.subr.bf16.mxu0 %v4798_v24 }
 0x309   : > { %4270 = vmatpush3.bf16.msra.mxu0 %v4944_v60 }
 0x30a   : > { %4271 = vmatprep.subr.bf16.mxu0 %v4798_v24 }
 0x30d   : > { %4272 = vmatpush3.bf16.msra.mxu0 %v4950_v5 }
 0x30e   : > { %4297 = vmatprep.subr.bf16.mxu0 %v4798_v24 }
 0x310   : > { %4274 = vmatmul.mubr.msk.bf16.vlgmr.msra.gmra.mrb[24].mxu0 %vm597_vm1, %v4718_v57 }
 0x311   : > { %4301 = vmatprep.mubr.msk.bf16.mxu0 %vm4799_vm0, %v4798_v24  ;;  %4298 = vmatpush3.bf16.msra.mxu0 %v4722_v10 }
 0x312   : > { %4299 = vmatprep.subr.bf16.mxu0 %v4798_v24 }
 0x315   : > { %4300 = vmatpush3.bf16.msra.mxu0 %v4723_v11 }
 0x316   : > { %4305 = vmatprep.subr.bf16.mxu0 %v4798_v24 }
 0x3d3   : > { %v1041_v61 = vpop.f32.mrb[20].mxu0 }
 0x3d4   : > { %v1048_v62 = vadd.f32 %v1041_v61, %v932_v46  ;;  %v4263_v63 = vpop.f32.mrb[21].mxu0 }
 0x3d5   : > { %v1044_v0 = vpop.f32.mrb[22].mxu0 }
 0x3d6   : > { %v1049_v1 = vadd.f32 %v1044_v0, %v933_v50  ;;  %v4264_v2 = vpop.f32.mrb[23].mxu0 }
 0x3e3   : > { %v1095_v3 = vpop.f32.mrb[24].mxu0 }
 0x3e4   : > { %v4275_v4 = vpop.f32.mrb[25].mxu0 }
 0x3e5   : > { %v1098_v6 = vpop.f32.mrb[26].mxu0 }
 0x3e6   : > { %v1102_v7 = vpack.c.bf16 %v1098_v6, %v1095_v3  ;;  %v4276_v8 = vpop.f32.mrb[27].mxu0  ;;  %v4733_v6 = vld [vmem:[%s5595_s3 + $0x48] sm:$0x1f]  }
 0x3e7   : > { %v4735_v8 = vld [vmem:[%s5596_s4 + $0x98] sm:$0xff]  }
 0x3e8   : > { %4282 = vmatmul.mubr.msk.bf16.vlgmr.msra.gmra.mrb[24].mxu1 %vm717_vm2, %v1102_v7  ;;  %v4734_v7 = vld [vmem:[%s5596_s4 + $0x90] sm:$0xff]  }
 0x3e9   : > { %4286 = vmatpush3.bf16.msra.mxu1 %v4932_v38  ;;  %4293 = vmatprep.mubr.msk.bf16.mxu1 %vm4799_vm0, %v4798_v24 }
 0x3ea   : > { %4287 = vmatprep.subr.bf16.mxu1 %v4798_v24 }
 0x3ed   : > { %4288 = vmatpush3.bf16.msra.mxu1 %v4938_v49 }
 0x3ee   : > { %4289 = vmatprep.subr.bf16.mxu1 %v4798_v24 }
 0x3f1   : > { %4290 = vmatpush3.bf16.msra.mxu1 %v4944_v60 }
 0x3f2   : > { %4291 = vmatprep.subr.bf16.mxu1 %v4798_v24 }
 0x3f5   : > { %4292 = vmatpush3.bf16.msra.mxu1 %v4950_v5 }
 0x3f6   : > { %4317 = vmatprep.subr.bf16.mxu1 %v4798_v24 }
 0x3f8   : > { %4294 = vmatmul.mubr.msk.bf16.vlgmr.msra.gmra.mrb[28].mxu1 %vm597_vm1, %v4721_v9 }
 0x3f9   : > { %4321 = vmatprep.mubr.msk.bf16.mxu1 %vm4799_vm0, %v4798_v24  ;;  %4318 = vmatpush3.bf16.msra.mxu1 %v4725_v25 }
 0x3fa   : > { %4319 = vmatprep.subr.bf16.mxu1 %v4798_v24 }
 0x3fd   : > { %4320 = vmatpush3.bf16.msra.mxu1 %v4726_v26 }
 0x3fe   : > { %4325 = vmatprep.subr.bf16.mxu1 %v4798_v24 }
 0x4bb   : > { %v1157_v12 = vpop.f32.mrb[24].mxu1 }
 0x4bc   : > { %v1164_v13 = vadd.f32 %v1157_v12, %v1048_v62  ;;  %v4283_v14 = vpop.f32.mrb[25].mxu1 }
 0x4bd   : > { %v1160_v15 = vpop.f32.mrb[26].mxu1 }
 0x4be   : > { %v1165_v16 = vadd.f32 %v1160_v15, %v1049_v1  ;;  %v4284_v17 = vpop.f32.mrb[27].mxu1 }
 0x4cb   : > { %v1211_v18 = vpop.f32.mrb[28].mxu1 }
 0x4cc   : > { %v4295_v19 = vpop.f32.mrb[29].mxu1 }
 0x4cd   : > { %v1214_v20 = vpop.f32.mrb[30].mxu1 }
 0x4ce   : > { %v1218_v21 = vpack.c.bf16 %v1214_v20, %v1211_v18  ;;  %v4296_v22 = vpop.f32.mrb[31].mxu1  ;;  %v4736_v20 = vld [vmem:[%s5595_s3 + $0x50] sm:$0x1f]  }
 0x4cf   : > { %v4738_v22 = vld [vmem:[%s5596_s4 + $0xa8] sm:$0xff]  }
 0x4d0   : > { %4302 = vmatmul.mubr.msk.bf16.vlgmr.msra.gmra.mrb[28].mxu0 %vm717_vm2, %v1218_v21  ;;  %v4737_v21 = vld [vmem:[%s5596_s4 + $0xa0] sm:$0xff]  }
 0x4d1   : > { %4306 = vmatpush3.bf16.msra.mxu0 %v4932_v38  ;;  %4313 = vmatprep.mubr.msk.bf16.mxu0 %vm4799_vm0, %v4798_v24 }
 0x4d2   : > { %4307 = vmatprep.subr.bf16.mxu0 %v4798_v24 }
 0x4d5   : > { %4308 = vmatpush3.bf16.msra.mxu0 %v4938_v49 }
 0x4d6   : > { %4309 = vmatprep.subr.bf16.mxu0 %v4798_v24 }
 0x4d9   : > { %4310 = vmatpush3.bf16.msra.mxu0 %v4944_v60 }
 0x4da   : > { %4311 = vmatprep.subr.bf16.mxu0 %v4798_v24 }
 0x4dd   : > { %4312 = vmatpush3.bf16.msra.mxu0 %v4950_v5 }
 0x4de   : > { %4337 = vmatprep.subr.bf16.mxu0 %v4798_v24 }
 0x4e0   : > { %4314 = vmatmul.mubr.msk.bf16.vlgmr.msra.gmra.mrb[32].mxu0 %vm597_vm1, %v4724_v23 }
 0x4e1   : > { %4341 = vmatprep.mubr.msk.bf16.mxu0 %vm4799_vm0, %v4798_v24  ;;  %4338 = vmatpush3.bf16.msra.mxu0 %v4728_v40 }
 0x4e2   : > { %4339 = vmatprep.subr.bf16.mxu0 %v4798_v24 }
 0x4e5   : > { %4340 = vmatpush3.bf16.msra.mxu0 %v4729_v41 }
 0x4e6   : > { %4345 = vmatprep.subr.bf16.mxu0 %v4798_v24 }
 0x5a3   : > { %v1273_v27 = vpop.f32.mrb[28].mxu0 }
 0x5a4   : > { %v1280_v28 = vadd.f32 %v1273_v27, %v1164_v13  ;;  %v4303_v29 = vpop.f32.mrb[29].mxu0 }
 0x5a5   : > { %v1276_v30 = vpop.f32.mrb[30].mxu0 }
 0x5a6   : > { %v1281_v31 = vadd.f32 %v1276_v30, %v1165_v16  ;;  %v4304_v32 = vpop.f32.mrb[31].mxu0 }
 0x5b3   : > { %v1327_v33 = vpop.f32.mrb[32].mxu0 }
 0x5b4   : > { %v4315_v34 = vpop.f32.mrb[33].mxu0 }
 0x5b5   : > { %v1330_v35 = vpop.f32.mrb[34].mxu0 }
 0x5b6   : > { %v1334_v36 = vpack.c.bf16 %v1330_v35, %v1327_v33  ;;  %v4316_v37 = vpop.f32.mrb[35].mxu0  ;;  %v4739_v35 = vld [vmem:[%s5595_s3 + $0x58] sm:$0x1f]  }
 0x5b7   : > { %v4741_v37 = vld [vmem:[%s5596_s4 + $0xb8] sm:$0xff]  }
 0x5b8   : > { %4322 = vmatmul.mubr.msk.bf16.vlgmr.msra.gmra.mrb[32].mxu1 %vm717_vm2, %v1334_v36  ;;  %v4740_v36 = vld [vmem:[%s5596_s4 + $0xb0] sm:$0xff]  }
 0x5b9   : > { %4326 = vmatpush3.bf16.msra.mxu1 %v4932_v38  ;;  %4333 = vmatprep.mubr.msk.bf16.mxu1 %vm4799_vm0, %v4798_v24 }
 0x5ba   : > { %4327 = vmatprep.subr.bf16.mxu1 %v4798_v24 }
 0x5bd   : > { %4328 = vmatpush3.bf16.msra.mxu1 %v4938_v49 }
 0x5be   : > { %4329 = vmatprep.subr.bf16.mxu1 %v4798_v24 }
 0x5c1   : > { %4330 = vmatpush3.bf16.msra.mxu1 %v4944_v60 }
 0x5c2   : > { %4331 = vmatprep.subr.bf16.mxu1 %v4798_v24 }
 0x5c5   : > { %4332 = vmatpush3.bf16.msra.mxu1 %v4950_v5 }
 0x5c6   : > { %4357 = vmatprep.subr.bf16.mxu1 %v4798_v24 }
 0x5c8   : > { %4334 = vmatmul.mubr.msk.bf16.vlgmr.msra.gmra.mrb[36].mxu1 %vm597_vm1, %v4727_v39 }
 0x5c9   : > { %4361 = vmatprep.mubr.msk.bf16.mxu1 %vm4799_vm0, %v4798_v24  ;;  %4358 = vmatpush3.bf16.msra.mxu1 %v4731_v55 }
 0x5ca   : > { %4359 = vmatprep.subr.bf16.mxu1 %v4798_v24 }
 0x5cd   : > { %4360 = vmatpush3.bf16.msra.mxu1 %v4732_v56 }
 0x5ce   : > { %4365 = vmatprep.subr.bf16.mxu1 %v4798_v24 }
 0x68b   : > { %v1389_v42 = vpop.f32.mrb[32].mxu1 }
 0x68c   : > { %v1396_v43 = vadd.f32 %v1389_v42, %v1280_v28  ;;  %v4323_v44 = vpop.f32.mrb[33].mxu1 }
 0x68d   : > { %v1392_v45 = vpop.f32.mrb[34].mxu1 }
 0x68e   : > { %v1397_v46 = vadd.f32 %v1392_v45, %v1281_v31  ;;  %v4324_v47 = vpop.f32.mrb[35].mxu1 }
 0x69b   : > { %v1443_v48 = vpop.f32.mrb[36].mxu1 }
 0x69c   : > { %v4335_v50 = vpop.f32.mrb[37].mxu1 }
 0x69d   : > { %v1446_v51 = vpop.f32.mrb[38].mxu1 }
 0x69e   : > { %v1450_v52 = vpack.c.bf16 %v1446_v51, %v1443_v48  ;;  %v4336_v53 = vpop.f32.mrb[39].mxu1  ;;  %v4742_v51 = vld [vmem:[%s5595_s3 + $0x60] sm:$0x1f]  }
 0x69f   : > { %v4744_v53 = vld [vmem:[%s5596_s4 + $0xc8] sm:$0xff]  }
 0x6a0   : > { %4342 = vmatmul.mubr.msk.bf16.vlgmr.msra.gmra.mrb[36].mxu0 %vm717_vm2, %v1450_v52  ;;  %v4743_v52 = vld [vmem:[%s5596_s4 + $0xc0] sm:$0xff]  }
 0x6a1   : > { %4346 = vmatpush3.bf16.msra.mxu0 %v4932_v38  ;;  %4353 = vmatprep.mubr.msk.bf16.mxu0 %vm4799_vm0, %v4798_v24 }
 0x6a2   : > { %4347 = vmatprep.subr.bf16.mxu0 %v4798_v24 }
 0x6a5   : > { %4348 = vmatpush3.bf16.msra.mxu0 %v4938_v49 }
 0x6a6   : > { %4349 = vmatprep.subr.bf16.mxu0 %v4798_v24 }
 0x6a9   : > { %4350 = vmatpush3.bf16.msra.mxu0 %v4944_v60 }
 0x6aa   : > { %4351 = vmatprep.subr.bf16.mxu0 %v4798_v24 }
 0x6ad   : > { %4352 = vmatpush3.bf16.msra.mxu0 %v4950_v5 }
 0x6ae   : > { %4377 = vmatprep.subr.bf16.mxu0 %v4798_v24 }
 0x6b0   : > { %4354 = vmatmul.mubr.msk.bf16.vlgmr.msra.gmra.mrb[40].mxu0 %vm597_vm1, %v4730_v54 }
 0x6b1   : > { %4381 = vmatprep.mubr.msk.bf16.mxu0 %vm4799_vm0, %v4798_v24  ;;  %4378 = vmatpush3.bf16.msra.mxu0 %v4734_v7 }
 0x6b2   : > { %4379 = vmatprep.subr.bf16.mxu0 %v4798_v24 }
 0x6b5   : > { %4380 = vmatpush3.bf16.msra.mxu0 %v4735_v8 }
 0x6b6   : > { %4385 = vmatprep.subr.bf16.mxu0 %v4798_v24 }
 0x773   : > { %v1505_v57 = vpop.f32.mrb[36].mxu0 }
 0x774   : > { %v1512_v58 = vadd.f32 %v1505_v57, %v1396_v43  ;;  %v4343_v59 = vpop.f32.mrb[37].mxu0 }
 0x775   : > { %v1508_v61 = vpop.f32.mrb[38].mxu0 }
 0x776   : > { %v1513_v62 = vadd.f32 %v1508_v61, %v1397_v46  ;;  %v4344_v63 = vpop.f32.mrb[39].mxu0 }
 0x783   : > { %v1559_v0 = vpop.f32.mrb[40].mxu0 }
 0x784   : > { %v4355_v1 = vpop.f32.mrb[41].mxu0 }
 0x785   : > { %v1562_v2 = vpop.f32.mrb[42].mxu0 }
 0x786   : > { %v1566_v3 = vpack.c.bf16 %v1562_v2, %v1559_v0  ;;  %v4356_v4 = vpop.f32.mrb[43].mxu0  ;;  %v4745_v2 = vld [vmem:[%s5595_s3 + $0x68] sm:$0x1f]  }
 0x787   : > { %v4747_v4 = vld [vmem:[%s5596_s4 + $0xd8] sm:$0xff]  }
 0x788   : > { %4362 = vmatmul.mubr.msk.bf16.vlgmr.msra.gmra.mrb[40].mxu1 %vm717_vm2, %v1566_v3  ;;  %v4746_v3 = vld [vmem:[%s5596_s4 + $0xd0] sm:$0xff]  }
 0x789   : > { %4366 = vmatpush3.bf16.msra.mxu1 %v4932_v38  ;;  %4373 = vmatprep.mubr.msk.bf16.mxu1 %vm4799_vm0, %v4798_v24 }
 0x78a   : > { %4367 = vmatprep.subr.bf16.mxu1 %v4798_v24 }
 0x78d   : > { %4368 = vmatpush3.bf16.msra.mxu1 %v4938_v49 }
 0x78e   : > { %4369 = vmatprep.subr.bf16.mxu1 %v4798_v24 }
 0x791   : > { %4370 = vmatpush3.bf16.msra.mxu1 %v4944_v60 }
 0x792   : > { %4371 = vmatprep.subr.bf16.mxu1 %v4798_v24 }
 0x795   : > { %4372 = vmatpush3.bf16.msra.mxu1 %v4950_v5 }
 0x796   : > { %4397 = vmatprep.subr.bf16.mxu1 %v4798_v24 }
 0x798   : > { %4374 = vmatmul.mubr.msk.bf16.vlgmr.msra.gmra.mrb[44].mxu1 %vm597_vm1, %v4733_v6 }
 0x799   : > { %4401 = vmatprep.mubr.msk.bf16.mxu1 %vm4799_vm0, %v4798_v24  ;;  %4398 = vmatpush3.bf16.msra.mxu1 %v4737_v21 }
 0x79a   : > { %4399 = vmatprep.subr.bf16.mxu1 %v4798_v24 }
 0x79d   : > { %4400 = vmatpush3.bf16.msra.mxu1 %v4738_v22 }
 0x79e   : > { %4405 = vmatprep.subr.bf16.mxu1 %v4798_v24 }
 0x85b   : > { %v1621_v9 = vpop.f32.mrb[40].mxu1 }
 0x85c   : > { %v1628_v10 = vadd.f32 %v1621_v9, %v1512_v58  ;;  %v4363_v11 = vpop.f32.mrb[41].mxu1 }
 0x85d   : > { %v1624_v12 = vpop.f32.mrb[42].mxu1 }
 0x85e   : > { %v1629_v13 = vadd.f32 %v1624_v12, %v1513_v62  ;;  %v4364_v14 = vpop.f32.mrb[43].mxu1 }
 0x86b   : > { %v1675_v15 = vpop.f32.mrb[44].mxu1 }
 0x86c   : > { %v4375_v16 = vpop.f32.mrb[45].mxu1 }
 0x86d   : > { %v1678_v17 = vpop.f32.mrb[46].mxu1 }
 0x86e   : > { %v1682_v18 = vpack.c.bf16 %v1678_v17, %v1675_v15  ;;  %v4376_v19 = vpop.f32.mrb[47].mxu1  ;;  %v4748_v17 = vld [vmem:[%s5595_s3 + $0x70] sm:$0x1f]  }
 0x86f   : > { %v4750_v19 = vld [vmem:[%s5596_s4 + $0xe8] sm:$0xff]  }
 0x870   : > { %4382 = vmatmul.mubr.msk.bf16.vlgmr.msra.gmra.mrb[44].mxu0 %vm717_vm2, %v1682_v18  ;;  %v4749_v18 = vld [vmem:[%s5596_s4 + $0xe0] sm:$0xff]  }
 0x871   : > { %4386 = vmatpush3.bf16.msra.mxu0 %v4932_v38  ;;  %4393 = vmatprep.mubr.msk.bf16.mxu0 %vm4799_vm0, %v4798_v24 }
 0x872   : > { %4387 = vmatprep.subr.bf16.mxu0 %v4798_v24 }
 0x875   : > { %4388 = vmatpush3.bf16.msra.mxu0 %v4938_v49 }
 0x876   : > { %4389 = vmatprep.subr.bf16.mxu0 %v4798_v24 }
 0x879   : > { %4390 = vmatpush3.bf16.msra.mxu0 %v4944_v60 }
 0x87a   : > { %4391 = vmatprep.subr.bf16.mxu0 %v4798_v24 }
 0x87d   : > { %4392 = vmatpush3.bf16.msra.mxu0 %v4950_v5 }
 0x87e   : > { %4417 = vmatprep.subr.bf16.mxu0 %v4798_v24 }
 0x880   : > { %4394 = vmatmul.mubr.msk.bf16.vlgmr.msra.gmra.mrb[48].mxu0 %vm597_vm1, %v4736_v20 }
 0x881   : > { %4421 = vmatprep.mubr.msk.bf16.mxu0 %vm4799_vm0, %v4798_v24  ;;  %4418 = vmatpush3.bf16.msra.mxu0 %v4740_v36 }
 0x882   : > { %4419 = vmatprep.subr.bf16.mxu0 %v4798_v24 }
 0x885   : > { %4420 = vmatpush3.bf16.msra.mxu0 %v4741_v37 }
 0x886   : > { %4425 = vmatprep.subr.bf16.mxu0 %v4798_v24 }
 0x943   : > { %v1737_v23 = vpop.f32.mrb[44].mxu0 }
 0x944   : > { %v1744_v25 = vadd.f32 %v1737_v23, %v1628_v10  ;;  %v4383_v26 = vpop.f32.mrb[45].mxu0 }
 0x945   : > { %v1740_v27 = vpop.f32.mrb[46].mxu0 }
 0x946   : > { %v1745_v28 = vadd.f32 %v1740_v27, %v1629_v13  ;;  %v4384_v29 = vpop.f32.mrb[47].mxu0 }
 0x953   : > { %v1791_v30 = vpop.f32.mrb[48].mxu0 }
 0x954   : > { %v4395_v31 = vpop.f32.mrb[49].mxu0 }
 0x955   : > { %v1794_v32 = vpop.f32.mrb[50].mxu0 }
 0x956   : > { %v1798_v33 = vpack.c.bf16 %v1794_v32, %v1791_v30  ;;  %v4396_v34 = vpop.f32.mrb[51].mxu0  ;;  %v4751_v32 = vld [vmem:[%s5595_s3 + $0x78] sm:$0x1f]  }
 0x958   : > { %4402 = vmatmul.mubr.msk.bf16.vlgmr.msra.gmra.mrb[48].mxu1 %vm717_vm2, %v1798_v33 }
 0x959   : > { %4406 = vmatpush3.bf16.msra.mxu1 %v4932_v38  ;;  %4413 = vmatprep.mubr.msk.bf16.mxu1 %vm4799_vm0, %v4798_v24 }
 0x95a   : > { %4407 = vmatprep.subr.bf16.mxu1 %v4798_v24 }
 0x95d   : > { %4408 = vmatpush3.bf16.msra.mxu1 %v4938_v49 }
 0x95e   : > { %4409 = vmatprep.subr.bf16.mxu1 %v4798_v24 }
 0x961   : > { %4410 = vmatpush3.bf16.msra.mxu1 %v4944_v60 }
 0x962   : > { %4411 = vmatprep.subr.bf16.mxu1 %v4798_v24 }
 0x965   : > { %4412 = vmatpush3.bf16.msra.mxu1 %v4950_v5 }
 0x966   : > { %4437 = vmatprep.subr.bf16.mxu1 %v4798_v24 }
 0x968   : > { %4414 = vmatmul.mubr.msk.bf16.vlgmr.msra.gmra.mrb[52].mxu1 %vm597_vm1, %v4739_v35 }
 0x969   : > { %4441 = vmatprep.mubr.msk.bf16.mxu1 %vm4799_vm0, %v4798_v24  ;;  %4438 = vmatpush3.bf16.msra.mxu1 %v4743_v52 }
 0x96a   : > { %4439 = vmatprep.subr.bf16.mxu1 %v4798_v24 }
 0x96d   : > { %4440 = vmatpush3.bf16.msra.mxu1 %v4744_v53  ;;  %v4800_v53 = vmov 65535  }
 0x96e   : > { %4445 = vmatprep.subr.bf16.mxu1 %v4798_v24 }
 0xa2b   : > { %v1853_v39 = vpop.f32.mrb[48].mxu1 }
 0xa2c   : > { %v1860_v40 = vadd.f32 %v1853_v39, %v1744_v25  ;;  %v4403_v41 = vpop.f32.mrb[49].mxu1 }
 0xa2d   : > { %v1856_v42 = vpop.f32.mrb[50].mxu1 }
 0xa2e   : > { %v1861_v43 = vadd.f32 %v1856_v42, %v1745_v28  ;;  %v4404_v44 = vpop.f32.mrb[51].mxu1 }
 0xa2f   : > { %v3824_v44 = vld [vmem:[%s5597_s5] ss:$0 sm:$0xff] }
 0xa3b   : > { %v1907_v45 = vpop.f32.mrb[52].mxu1 }
 0xa3c   : > { %v4415_v46 = vpop.f32.mrb[53].mxu1 }
 0xa3d   : > { %v1910_v47 = vpop.f32.mrb[54].mxu1 }
 0xa3e   : > { %v1914_v48 = vpack.c.bf16 %v1910_v47, %v1907_v45  ;;  %v4416_v50 = vpop.f32.mrb[55].mxu1 }
 0xa40   : > { %4422 = vmatmul.mubr.msk.bf16.vlgmr.msra.gmra.mrb[52].mxu0 %vm717_vm2, %v1914_v48 }
 0xa41   : > { %4426 = vmatpush3.bf16.msra.mxu0 %v4932_v38  ;;  %4433 = vmatprep.mubr.msk.bf16.mxu0 %vm4799_vm0, %v4798_v24 }
 0xa42   : > { %4427 = vmatprep.subr.bf16.mxu0 %v4798_v24 }
 0xa45   : > { %4428 = vmatpush3.bf16.msra.mxu0 %v4938_v49 }
 0xa46   : > { %4429 = vmatprep.subr.bf16.mxu0 %v4798_v24 }
 0xa49   : > { %4430 = vmatpush3.bf16.msra.mxu0 %v4944_v60 }
 0xa4a   : > { %4431 = vmatprep.subr.bf16.mxu0 %v4798_v24 }
 0xa4d   : > { %4432 = vmatpush3.bf16.msra.mxu0 %v4950_v5 }
 0xa4e   : > { %4457 = vmatprep.subr.bf16.mxu0 %v4798_v24 }
 0xa50   : > { %4434 = vmatmul.mubr.msk.bf16.vlgmr.msra.gmra.mrb[56].mxu0 %vm597_vm1, %v4742_v51 }
 0xa51   : > { %4461 = vmatprep.mubr.msk.bf16.mxu0 %vm4799_vm0, %v4798_v24  ;;  %4458 = vmatpush3.bf16.msra.mxu0 %v4746_v3  ;;  %v4757_v3 = vld [vmem:[%s5599_s7 + $0x30] sm:$0xff]  }
 0xa52   : > { %4459 = vmatprep.subr.bf16.mxu0 %v4798_v24 }
 0xa55   : > { %4460 = vmatpush3.bf16.msra.mxu0 %v4747_v4  ;;  %v4759_v4 = vld [vmem:[%s5599_s7 + $0x38] sm:$0xff]  }
 0xa56   : > { %4465 = vmatprep.subr.bf16.mxu0 %v4798_v24 }
 0xb13   : > { %v1969_v54 = vpop.f32.mrb[52].mxu0 }
 0xb14   : > { %v1976_v55 = vadd.f32 %v1969_v54, %v1860_v40  ;;  %v4423_v56 = vpop.f32.mrb[53].mxu0  ;;  %v2461_v54 = vsel %vm2459_vm3, 4294967295, %v4800_v53  ;;  %v4775_v53 = vld [vmem:[%s5599_s7 + $0xa8] sm:$0xff]  }
 0xb15   : > { %v1972_v57 = vpop.f32.mrb[54].mxu0 }
 0xb16   : > { %v1977_v58 = vadd.f32 %v1972_v57, %v1861_v43  ;;  %v4424_v59 = vpop.f32.mrb[55].mxu0  ;;  %v2462_v57 = vsel %vm2460_vm4, %v2461_v54, 0  ;;  %v4776_v54 = vld [vmem:[%s5599_s7 + $0xb0] sm:$0xff]  }
 0xb23   : > { %v2023_v61 = vpop.f32.mrb[56].mxu0 }
 0xb24   : > { %v4435_v62 = vpop.f32.mrb[57].mxu0 }
 0xb25   : > { %v2026_v63 = vpop.f32.mrb[58].mxu0  ;;  %v2454_v62 = vld [vmem:[%s5598_s6] sm:$0x1] }
 0xb26   : > { %v2030_v0 = vpack.c.bf16 %v2026_v63, %v2023_v61  ;;  %v4436_v1 = vpop.f32.mrb[59].mxu0  ;;  %v3826_v61 = vld [vmem:[%s5598_s6 + $0x1] sm:$0x1] }
 0xb27   : > { %v4754_v63 = vld [vmem:[%s5599_s7 + $0x20] sm:$0xff]   ;;  %v4755_v1 = vld [vmem:[%s5599_s7 + $0x28] sm:$0xff]  }
 0xb28   : > { %4442 = vmatmul.mubr.msk.bf16.vlgmr.msra.gmra.mrb[56].mxu1 %vm717_vm2, %v2030_v0  ;;  %v4756_v0 = vld [vmem:[%s5599_s7] sm:$0xff]  }
 0xb29   : > { %4446 = vmatpush3.bf16.msra.mxu1 %v4932_v38  ;;  %4453 = vmatprep.mubr.msk.bf16.mxu1 %vm4799_vm0, %v4798_v24 }
 0xb2a   : > { %4447 = vmatprep.subr.bf16.mxu1 %v4798_v24 }
 0xb2d   : > { %4448 = vmatpush3.bf16.msra.mxu1 %v4938_v49 }
 0xb2e   : > { %4449 = vmatprep.subr.bf16.mxu1 %v4798_v24 }
 0xb31   : > { %4450 = vmatpush3.bf16.msra.mxu1 %v4944_v60 }
 0xb32   : > { %4451 = vmatprep.subr.bf16.mxu1 %v4798_v24 }
 0xb35   : > { %4452 = vmatpush3.bf16.msra.mxu1 %v4950_v5 }
 0xb36   : > { %4477 = vmatprep.subr.bf16.mxu1 %v4798_v24 }
 0xb38   : > { %4454 = vmatmul.mubr.msk.bf16.vlgmr.msra.gmra.mrb[60].mxu1 %vm597_vm1, %v4745_v2  ;;  %v4758_v2 = vld [vmem:[%s5599_s7 + $0x8] sm:$0xff]  }
 0xb39   : > { %4481 = vmatprep.mubr.msk.bf16.mxu1 %vm4799_vm0, %v4798_v24  ;;  %4478 = vmatpush3.bf16.msra.mxu1 %v4749_v18 }
 0xb3a   : > { %4479 = vmatprep.subr.bf16.mxu1 %v4798_v24 }
 0xb3d   : > { %4480 = vmatpush3.bf16.msra.mxu1 %v4750_v19  ;;  %v4763_v19 = vld [vmem:[%s5599_s7 + $0x48] sm:$0xff]  }
 0xb3e   : > { %4485 = vmatprep.subr.bf16.mxu1 %v4798_v24 }
 0xbfb   : > { %v2085_v6 = vpop.f32.mrb[56].mxu1 }
 0xbfc   : > { %v2092_v7 = vadd.f32 %v2085_v6, %v1976_v55  ;;  %v4443_v8 = vpop.f32.mrb[57].mxu1  ;;  %v4760_v6 = vld [vmem:[%s5599_s7 + $0x10] sm:$0xff]  }
 0xbfd   : > { %v2088_v9 = vpop.f32.mrb[58].mxu1 }
 0xbfe   : > { %v2093_v10 = vadd.f32 %v2088_v9, %v1977_v58  ;;  %v4444_v11 = vpop.f32.mrb[59].mxu1 }
 0xc0b   : > { %v2139_v12 = vpop.f32.mrb[60].mxu1 }
 0xc0c   : > { %v4455_v13 = vpop.f32.mrb[61].mxu1 }
 0xc0d   : > { %v2142_v14 = vpop.f32.mrb[62].mxu1 }
 0xc0e   : > { %v2146_v15 = vpack.c.bf16 %v2142_v14, %v2139_v12  ;;  %v4456_v16 = vpop.f32.mrb[63].mxu1  ;;  %v4762_v14 = vld [vmem:[%s5599_s7 + $0x40] sm:$0xff]  }
 0xc10   : > { %4462 = vmatmul.mubr.msk.bf16.vlgmr.msra.gmra.mrb[60].mxu0 %vm717_vm2, %v2146_v15 }
 0xc11   : > { %4466 = vmatpush3.bf16.msra.mxu0 %v4932_v38  ;;  %4473 = vmatprep.mubr.msk.bf16.mxu0 %vm4799_vm0, %v4798_v24 }
 0xc12   : > { %4467 = vmatprep.subr.bf16.mxu0 %v4798_v24 }
 0xc15   : > { %4468 = vmatpush3.bf16.msra.mxu0 %v4938_v49 }
 0xc16   : > { %4469 = vmatprep.subr.bf16.mxu0 %v4798_v24 }
 0xc19   : > { %4470 = vmatpush3.bf16.msra.mxu0 %v4944_v60 }
 0xc1a   : > { %4471 = vmatprep.subr.bf16.mxu0 %v4798_v24 }
 0xc1d   : > { %4472 = vmatpush3.bf16.msra.mxu0 %v4950_v5 }
 0xc1e   : > { %4497 = vmatprep.subr.bf16.mxu0 %v4798_v24 }
 0xc20   : > { %4474 = vmatmul.mubr.msk.bf16.vlgmr.msra.gmra.mrb[64].mxu0 %vm597_vm1, %v4748_v17 }
 0xc21   : > { %4501 = vmatprep.mubr.msk.bf16.mxu0 %vm4799_vm0, %v4798_v24 }
 0xce3   : > { %v2201_v20 = vpop.f32.mrb[60].mxu0 }
 0xce4   : > { %v2208_v21 = vadd.f32 %v2201_v20, %v2092_v7  ;;  %v4463_v22 = vpop.f32.mrb[61].mxu0  ;;  %v4761_v7 = vld [vmem:[%s5599_s7 + $0x18] sm:$0xff]   ;;  %v3846_v20 = vld [vmem:[%s5598_s6 + $0x2] sm:$0x1] }
 0xce5   : > { %v2204_v23 = vpop.f32.mrb[62].mxu0  ;;  %v4764_v22 = vld [vmem:[%s5599_s7 + $0x50] sm:$0xff]  }
 0xce6   : > { %v2209_v25 = vadd.f32 %v2204_v23, %v2093_v10  ;;  %v4464_v26 = vpop.f32.mrb[63].mxu0  ;;  %v4765_v23 = vld [vmem:[%s5599_s7 + $0x60] sm:$0xff]  }
 0xce7   : > { %v4767_v26 = vld [vmem:[%s5599_s7 + $0x68] sm:$0xff]  }
 0xcf3   : > { %v2255_v27 = vpop.f32.mrb[64].mxu0 }
 0xcf4   : > { %v4475_v28 = vpop.f32.mrb[65].mxu0 }
 0xcf5   : > { %v2258_v29 = vpop.f32.mrb[66].mxu0  ;;  %v4769_v28 = vld [vmem:[%s5599_s7 + $0x78] sm:$0xff]  }
 0xcf6   : > { %v2262_v30 = vpack.c.bf16 %v2258_v29, %v2255_v27  ;;  %v4476_v31 = vpop.f32.mrb[67].mxu0  ;;  %v4768_v27 = vld [vmem:[%s5599_s7 + $0x70] sm:$0xff]  }
 0xcf8   : > { %4482 = vmatmul.mubr.msk.bf16.vlgmr.msra.gmra.mrb[64].mxu1 %vm717_vm2, %v2262_v30 }
 0xcf9   : > { %4486 = vmatpush3.bf16.msra.mxu1 %v4932_v38  ;;  %4493 = vmatprep.mubr.msk.bf16.mxu1 %vm4799_vm0, %v4798_v24  ;;  %v4752_v38 = vld [vmem:[%s5596_s4 + $0xf0] sm:$0xff]  }
 0xcfa   : > { %4487 = vmatprep.subr.bf16.mxu1 %v4798_v24  ;;  %4498 = vmatpush3.bf16.msra.mxu0 %v4752_v38 }
 0xcfb   : > { %4499 = vmatprep.subr.bf16.mxu0 %v4798_v24 }
 0xcfd   : > { %4488 = vmatpush3.bf16.msra.mxu1 %v4938_v49  ;;  %v4753_v49 = vld [vmem:[%s5596_s4 + $0xf8] sm:$0xff]  }
 0xcfe   : > { %4489 = vmatprep.subr.bf16.mxu1 %v4798_v24  ;;  %4500 = vmatpush3.bf16.msra.mxu0 %v4753_v49 }
 0xcff   : > { %4505 = vmatprep.subr.bf16.mxu0 %v4798_v24 }
 0xd01   : > { %4490 = vmatpush3.bf16.msra.mxu1 %v4944_v60 }
 0xd02   : > { %4491 = vmatprep.subr.bf16.mxu1 %v4798_v24 }
 0xd05   : > { %4492 = vmatpush3.bf16.msra.mxu1 %v4950_v5 }
 0xd06   : > { %4511 = vmatprep.subr.bf16.mxu1 %v4798_v24 }
 0xd08   : > { %4494 = vmatmul.mubr.msk.bf16.vlgmr.msra.gmra.mrb[68].mxu1 %vm597_vm1, %v4751_v32 }
 0xd09   : > { %4513 = vmatprep.mubr.msk.bf16.mxu1 %vm4799_vm0, %v4798_v24 }
 0xdcb   : > { %v2317_v60 = vpop.f32.mrb[64].mxu1 }
 0xdcc   : > { %v2324_v5 = vadd.f32 %v2317_v60, %v2208_v21  ;;  %v4483_v33 = vpop.f32.mrb[65].mxu1  ;;  %v3861_v21 = vld [vmem:[%s5598_s6 + $0x3] sm:$0x1] }
 0xdcd   : > { %v2320_v34 = vpop.f32.mrb[66].mxu1 }
 0xdce   : > { %v2325_v35 = vadd.f32 %v2320_v34, %v2209_v25  ;;  %v4484_v36 = vpop.f32.mrb[67].mxu1  ;;  %v4766_v25 = vld [vmem:[%s5599_s7 + $0x58] sm:$0xff]  }
 0xddb   : > { %v2371_v37 = vpop.f32.mrb[68].mxu1 }
 0xddc   : > { %v4495_v39 = vpop.f32.mrb[69].mxu1 }
 0xddd   : > { %v2374_v40 = vpop.f32.mrb[70].mxu1 }
 0xdde   : > { %v2378_v41 = vpack.c.bf16 %v2374_v40, %v2371_v37  ;;  %v4496_v42 = vpop.f32.mrb[71].mxu1 }
 0xde0   : > { %4502 = vmatmul.mubr.msk.bf16.vlgmr.msra.gmra.mrb[68].mxu0 %vm717_vm2, %v2378_v41  ;;  %v3876_v41 = vld [vmem:[%s5598_s6 + $0x4] sm:$0x1] }
 0xde1   : > { %4507 = vmatprep.mubr.msk.bf16.mxu0 %vm4799_vm0, %v4798_v24 }
 0xeb3   : > { %v2433_v43 = vpop.f32.mrb[68].mxu0 }
 0xeb4   : > { %v2440_v45 = vadd.f32 %v2433_v43, %v2324_v5  ;;  %v4503_v46 = vpop.f32.mrb[69].mxu0  ;;  %v4770_v43 = vld [vmem:[%s5599_s7 + $0x80] sm:$0xff]  }
 0xeb5   : > { %v2436_v47 = vpop.f32.mrb[70].mxu0 }
 0xeb6   : > { %v2449_v48 = vadd.f32 %v3824_v44, %v2440_v45  ;;  %v2441_v50 = vadd.f32 %v2436_v47, %v2325_v35  ;;  %v4504_v51 = vpop.f32.mrb[71].mxu0  ;;  %v4771_v47 = vld [vmem:[%s5599_s7 + $0x88] sm:$0xff]  }
 0xeb7   : > { %v4773_v51 = vld [vmem:[%s5599_s7 + $0xa0] sm:$0xff]  }
 0xeb8   : > { %v2450_v52 = vadd.f32 %v3824_v44, %v2441_v50  ;;  %v2451_v55 = vmax.f32 %v2449_v48, 0.0  ;;  %v3891_v48 = vld [vmem:[%s5598_s6 + $0x5] sm:$0x1]  ;;  %v4772_v50 = vld [vmem:[%s5599_s7 + $0x90] sm:$0xff]  }
 0xeba   : > { %v2452_v56 = vmax.f32 %v2450_v52, 0.0  ;;  %v4774_v52 = vld [vmem:[%s5599_s7 + $0x98] sm:$0xff]  }
 0xebc   : > { %v2453_v58 = vpack.c.bf16 %v2452_v56, %v2451_v55  ;;  %v4777_v55 = vld [vmem:[%s5599_s7 + $0xb8] sm:$0xff]  }
 0xebe   : > { %v5343_v59 = vand.u32 %v2462_v57, %v2453_v58 }
 0xec0   : > { %4506 = vmatpush3.bf16.msra.mxu0 %v5343_v59  ;;  %4512 = vmatpush3.bf16.msra.mxu1 %v5343_v59 }
 0xec1   : > { %4517 = vmatprep.subr.bf16.mxu0 %v4798_v24  ;;  %4529 = vmatprep.subr.bf16.mxu1 %v4798_v24 }
 0xec3   : > { %4514 = vmatmul.mubr.msk.bf16.vlgmr.msra.gmra.mrb[72].mxu1 %vm2455_vm5, %v3826_v61  ;;  %4508 = vmatmul.mubr.msk.bf16.vlgmr.msra.gmra.mrb[72].mxu0 %vm2455_vm5, %v2454_v62 }
 0xec4   : > { %4518 = vmatpush3.bf16.msra.mxu0 %v4754_v63  ;;  %4530 = vmatpush3.bf16.msra.mxu1 %v4756_v0 }
 0xec5   : > { %4519 = vmatprep.subr.bf16.mxu0 %v4798_v24  ;;  %4531 = vmatprep.subr.bf16.mxu1 %v4798_v24 }
 0xec6   : > { %4525 = vmatprep.mubr.msk.bf16.mxu0 %vm4799_vm0, %v4798_v24  ;;  %4537 = vmatprep.mubr.msk.bf16.mxu1 %vm4799_vm0, %v4798_v24 }
 0xec8   : > { %4520 = vmatpush3.bf16.msra.mxu0 %v4755_v1  ;;  %4532 = vmatpush3.bf16.msra.mxu1 %v4758_v2 }
 0xec9   : > { %4521 = vmatprep.subr.bf16.mxu0 %v4798_v24  ;;  %4533 = vmatprep.subr.bf16.mxu1 %v4798_v24 }
 0xecc   : > { %4522 = vmatpush3.bf16.msra.mxu0 %v4757_v3  ;;  %4534 = vmatpush3.bf16.msra.mxu1 %v4760_v6 }
 0xecd   : > { %4523 = vmatprep.subr.bf16.mxu0 %v4798_v24  ;;  %4535 = vmatprep.subr.bf16.mxu1 %v4798_v24 }
 0xed0   : > { %4524 = vmatpush3.bf16.msra.mxu0 %v4759_v4  ;;  %4536 = vmatpush3.bf16.msra.mxu1 %v4761_v7 }
 0xed1   : > { %4541 = vmatprep.subr.bf16.mxu0 %v4798_v24  ;;  %4547 = vmatprep.subr.bf16.mxu1 %v4798_v24 }
 0xf96   : > { %v2554_v8 = vpop.f32.mrb[72].mxu1  ;;  %v2500_v9 = vpop.f32.mrb[72].mxu0 }
 0xf97   : > { %v2560_v10 = vpack.c.bf16 %v2554_v8, %v2554_v8  ;;  %v4515_v11 = vpop.f32.mrb[73].mxu1  ;;  %v2506_v12 = vpack.c.bf16 %v2500_v9, %v2500_v9  ;;  %v4509_v13 = vpop.f32.mrb[73].mxu0 }
 0xf98   : > { %v2557_v15 = vpop.f32.mrb[74].mxu1  ;;  %v2503_v16 = vpop.f32.mrb[74].mxu0  ;;  %v3906_v11 = vld [vmem:[%s5598_s6 + $0x6] sm:$0x1] }
 0xf99   : > { %4526 = vmatmul.mubr.msk.bf16.vlgmr.msra.gmra.mrb[76].mxu0 %vm597_vm1, %v2560_v10  ;;  %v4516_v17 = vpop.f32.mrb[75].mxu1  ;;  %4538 = vmatmul.mubr.msk.bf16.vlgmr.msra.gmra.mrb[76].mxu1 %vm597_vm1, %v2506_v12  ;;  %v4510_v18 = vpop.f32.mrb[75].mxu0  ;;  %v4778_v13 = vld [vmem:[%s5599_s7 + $0xc0] sm:$0xff]  }
 0xf9a   : > { %4542 = vmatpush3.bf16.msra.mxu0 %v5343_v59  ;;  %4543 = vmatprep.mubr.msk.bf16.mxu0 %vm4799_vm0, %v4798_v24  ;;  %v4779_v17 = vld [vmem:[%s5599_s7 + $0xc8] sm:$0xff]   ;;  %v3921_v18 = vld [vmem:[%s5598_s6 + $0x7] sm:$0x1] }
 0xf9b   : > { %4559 = vmatprep.subr.bf16.mxu0 %v4798_v24  ;;  %4548 = vmatpush3.bf16.msra.mxu1 %v4762_v14 }
 0xf9c   : > { %4549 = vmatprep.subr.bf16.mxu1 %v4798_v24  ;;  %4555 = vmatprep.mubr.msk.bf16.mxu1 %vm4799_vm0, %v4798_v24 }
 0xf9f   : > { %4550 = vmatpush3.bf16.msra.mxu1 %v4763_v19  ;;  %v4780_v19 = vld [vmem:[%s5599_s7 + $0xd0] sm:$0xff]  }
 0xfa0   : > { %4551 = vmatprep.subr.bf16.mxu1 %v4798_v24 }
 0xfa1   : > { %4544 = vmatmul.mubr.msk.bf16.vlgmr.msra.gmra.mrb[80].mxu0 %vm2455_vm5, %v3846_v20  ;;  %v4781_v20 = vld [vmem:[%s5599_s7 + $0xe0] sm:$0xff]  }
 0xfa2   : > { %4560 = vmatpush3.bf16.msra.mxu0 %v5343_v59  ;;  %4561 = vmatprep.mubr.msk.bf16.mxu0 %vm4799_vm0, %v4798_v24 }
 0xfa3   : > { %4565 = vmatprep.subr.bf16.mxu0 %v4798_v24  ;;  %4552 = vmatpush3.bf16.msra.mxu1 %v4764_v22  ;;  %v4783_v22 = vld [vmem:[%s5599_s7 + $0xe8] sm:$0xff]  }
 0xfa4   : > { %4553 = vmatprep.subr.bf16.mxu1 %v4798_v24 }
 0xfa7   : > { %4554 = vmatpush3.bf16.msra.mxu1 %v4766_v25  ;;  %v4785_v25 = vld [vmem:[%s5599_s7 + $0xf8] sm:$0xff]  }
 0xfa8   : > { %4577 = vmatprep.subr.bf16.mxu1 %v4798_v24 }
 0xfa9   : > { %4562 = vmatmul.mubr.msk.bf16.vlgmr.msra.gmra.mrb[84].mxu0 %vm2455_vm5, %v3861_v21  ;;  %v4782_v21 = vld [vmem:[%s5599_s7 + $0xd8] sm:$0xff]  }
 0xfaa   : > { %4573 = vmatprep.mubr.msk.bf16.mxu0 %vm4799_vm0, %v4798_v24  ;;  %4566 = vmatpush3.bf16.msra.mxu0 %v4765_v23  ;;  %v4784_v23 = vld [vmem:[%s5599_s7 + $0xf0] sm:$0xff]  }
 0xfab   : > { %4567 = vmatprep.subr.bf16.mxu0 %v4798_v24 }
 0xfae   : > { %4568 = vmatpush3.bf16.msra.mxu0 %v4767_v26 }
 0xfaf   : > { %4569 = vmatprep.subr.bf16.mxu0 %v4798_v24 }
 0xfb2   : > { %4570 = vmatpush3.bf16.msra.mxu0 %v4768_v27 }
 0xfb3   : > { %4571 = vmatprep.subr.bf16.mxu0 %v4798_v24 }
 0xfb6   : > { %4572 = vmatpush3.bf16.msra.mxu0 %v4769_v28 }
 0xfb7   : > { %4595 = vmatprep.subr.bf16.mxu0 %v4798_v24 }
0x106c   : > { %v2631_v29 = vpop.f32.mrb[76].mxu0  ;;  %v2698_v30 = vpop.f32.mrb[76].mxu1 }
0x106d   : > { %v4527_v31 = vpop.f32.mrb[77].mxu0  ;;  %v2699_v32 = vadd.f32 %v2698_v30, %v2631_v29  ;;  %v4539_v38 = vpop.f32.mrb[77].mxu1 }
0x106e   : > { %v2634_v49 = vpop.f32.mrb[78].mxu0  ;;  %v2701_v60 = vpop.f32.mrb[78].mxu1 }
0x106f   : > { %v4528_v5 = vpop.f32.mrb[79].mxu0  ;;  %v4540_v33 = vpop.f32.mrb[79].mxu1 }
0x1074   : > { %v2743_v34 = vpop.f32.mrb[80].mxu0 }
0x1075   : > { %v2749_v35 = vpack.c.bf16 %v2743_v34, %v2743_v34  ;;  %v4545_v36 = vpop.f32.mrb[81].mxu0 }
0x1076   : > { %v2746_v37 = vpop.f32.mrb[82].mxu0 }
0x1077   : > { %4556 = vmatmul.mubr.msk.bf16.vlgmr.msra.gmra.mrb[80].mxu1 %vm597_vm1, %v2749_v35  ;;  %v4546_v39 = vpop.f32.mrb[83].mxu0 }
0x1078   : > { %4578 = vmatpush3.bf16.msra.mxu1 %v5343_v59  ;;  %4579 = vmatprep.mubr.msk.bf16.mxu1 %vm4799_vm0, %v4798_v24  ;;  %v3936_v39 = vld [vmem:[%s5598_s6 + $0x8] sm:$0x1] }
0x1079   : > { %4583 = vmatprep.subr.bf16.mxu1 %v4798_v24 }
0x107c   : > { %v2866_v40 = vpop.f32.mrb[84].mxu0 }
0x107d   : > { %v2872_v42 = vpack.c.bf16 %v2866_v40, %v2866_v40  ;;  %v4563_v44 = vpop.f32.mrb[85].mxu0  ;;  %v4786_v40 = vld [vmem:[%s5599_s7 + $0x100] sm:$0xff]  }
0x107e   : > { %v2869_v45 = vpop.f32.mrb[86].mxu0  ;;  %v4787_v44 = vld [vmem:[%s5599_s7 + $0x108] sm:$0xff]  }
0x107f   : > { %4574 = vmatmul.mubr.msk.bf16.vlgmr.msra.gmra.mrb[88].mxu0 %vm597_vm1, %v2872_v42  ;;  %4580 = vmatmul.mubr.msk.bf16.vlgmr.msra.gmra.mrb[84].mxu1 %vm2455_vm5, %v3876_v41  ;;  %v4564_v46 = vpop.f32.mrb[87].mxu0  ;;  %v4788_v45 = vld [vmem:[%s5599_s7 + $0x110] sm:$0xff]  }
0x1080   : > { %4596 = vmatpush3.bf16.msra.mxu0 %v5343_v59  ;;  %4597 = vmatprep.mubr.msk.bf16.mxu0 %vm4799_vm0, %v4798_v24  ;;  %v4789_v46 = vld [vmem:[%s5599_s7 + $0x118] sm:$0xff]  }
0x1081   : > { %4584 = vmatpush3.bf16.msra.mxu1 %v4770_v43  ;;  %4601 = vmatprep.subr.bf16.mxu0 %v4798_v24 }
0x1082   : > { %4585 = vmatprep.subr.bf16.mxu1 %v4798_v24  ;;  %4591 = vmatprep.mubr.msk.bf16.mxu1 %vm4799_vm0, %v4798_v24 }
0x1085   : > { %4586 = vmatpush3.bf16.msra.mxu1 %v4771_v47 }
0x1086   : > { %4587 = vmatprep.subr.bf16.mxu1 %v4798_v24 }
0x1087   : > { %4598 = vmatmul.mubr.msk.bf16.vlgmr.msra.gmra.mrb[92].mxu0 %vm2455_vm5, %v3891_v48 }
0x1088   : > { %4609 = vmatprep.mubr.msk.bf16.mxu0 %vm4799_vm0, %v4798_v24  ;;  %4602 = vmatpush3.bf16.msra.mxu0 %v4773_v51 }
0x1089   : > { %4588 = vmatpush3.bf16.msra.mxu1 %v4772_v50  ;;  %4603 = vmatprep.subr.bf16.mxu0 %v4798_v24 }
0x108a   : > { %4589 = vmatprep.subr.bf16.mxu1 %v4798_v24 }
0x108c   : > { %4604 = vmatpush3.bf16.msra.mxu0 %v4775_v53 }
0x108d   : > { %4590 = vmatpush3.bf16.msra.mxu1 %v4774_v52  ;;  %4605 = vmatprep.subr.bf16.mxu0 %v4798_v24 }
0x108e   : > { %4613 = vmatprep.subr.bf16.mxu1 %v4798_v24 }
0x1090   : > { %4606 = vmatpush3.bf16.msra.mxu0 %v4776_v54 }
0x1091   : > { %4607 = vmatprep.subr.bf16.mxu0 %v4798_v24 }
0x1094   : > { %4608 = vmatpush3.bf16.msra.mxu0 %v4777_v55 }
0x1095   : > { %4631 = vmatprep.subr.bf16.mxu0 %v4798_v24 }
0x114a   : > { %v2820_v56 = vpop.f32.mrb[80].mxu1 }
0x114b   : > { %v2826_v57 = vadd.f32 %v2820_v56, %v2699_v32  ;;  %v4557_v58 = vpop.f32.mrb[81].mxu1 }
0x114c   : > { %v2823_v61 = vpop.f32.mrb[82].mxu1 }
0x114d   : > { %v4558_v62 = vpop.f32.mrb[83].mxu1 }
0x1152   : > { %v2943_v63 = vpop.f32.mrb[88].mxu0  ;;  %v2989_v0 = vpop.f32.mrb[84].mxu1 }
0x1153   : > { %v2949_v1 = vadd.f32 %v2943_v63, %v2826_v57  ;;  %v2995_v2 = vpack.c.bf16 %v2989_v0, %v2989_v0  ;;  %v4581_v3 = vpop.f32.mrb[85].mxu1  ;;  %v4575_v4 = vpop.f32.mrb[89].mxu0 }
0x1154   : > { %v2992_v6 = vpop.f32.mrb[86].mxu1  ;;  %v2946_v7 = vpop.f32.mrb[90].mxu0 }
0x1155   : > { %4592 = vmatmul.mubr.msk.bf16.vlgmr.msra.gmra.mrb[88].mxu1 %vm597_vm1, %v2995_v2  ;;  %v4582_v8 = vpop.f32.mrb[87].mxu1  ;;  %v4576_v9 = vpop.f32.mrb[91].mxu0 }
0x1156   : > { %4614 = vmatpush3.bf16.msra.mxu1 %v5343_v59  ;;  %4615 = vmatprep.mubr.msk.bf16.mxu1 %vm4799_vm0, %v4798_v24  ;;  %v3572_v9 = vld [vmem:[%s328_s13] sm:$0x1] }
0x1157   : > { %4619 = vmatprep.subr.bf16.mxu1 %v4798_v24 }
0x115a   : > { %v3112_v10 = vpop.f32.mrb[92].mxu0 }
0x115b   : > { %v3118_v12 = vpack.c.bf16 %v3112_v10, %v3112_v10  ;;  %v4599_v14 = vpop.f32.mrb[93].mxu0 }
0x115c   : > { %v3115_v15 = vpop.f32.mrb[94].mxu0 }
0x115d   : > { %4610 = vmatmul.mubr.msk.bf16.vlgmr.msra.gmra.mrb[96].mxu0 %vm597_vm1, %v3118_v12  ;;  %4616 = vmatmul.mubr.msk.bf16.vlgmr.msra.gmra.mrb[92].mxu1 %vm2455_vm5, %v3906_v11  ;;  %v4600_v16 = vpop.f32.mrb[95].mxu0 }
0x115e   : > { %4632 = vmatpush3.bf16.msra.mxu0 %v5343_v59  ;;  %4633 = vmatprep.mubr.msk.bf16.mxu0 %vm4799_vm0, %v4798_v24 }
0x115f   : > { %4620 = vmatpush3.bf16.msra.mxu1 %v4778_v13  ;;  %4637 = vmatprep.subr.bf16.mxu0 %v4798_v24 }
0x1160   : > { %4621 = vmatprep.subr.bf16.mxu1 %v4798_v24  ;;  %4627 = vmatprep.mubr.msk.bf16.mxu1 %vm4799_vm0, %v4798_v24 }
0x1163   : > { %4622 = vmatpush3.bf16.msra.mxu1 %v4779_v17 }
0x1164   : > { %4623 = vmatprep.subr.bf16.mxu1 %v4798_v24 }
0x1165   : > { %4634 = vmatmul.mubr.msk.bf16.vlgmr.msra.gmra.mrb[100].mxu0 %vm2455_vm5, %v3921_v18 }
0x1166   : > { %4645 = vmatprep.mubr.msk.bf16.mxu0 %vm4799_vm0, %v4798_v24  ;;  %4638 = vmatpush3.bf16.msra.mxu0 %v4781_v20 }
0x1167   : > { %4624 = vmatpush3.bf16.msra.mxu1 %v4780_v19  ;;  %4639 = vmatprep.subr.bf16.mxu0 %v4798_v24 }
0x1168   : > { %4625 = vmatprep.subr.bf16.mxu1 %v4798_v24 }
0x116a   : > { %4640 = vmatpush3.bf16.msra.mxu0 %v4783_v22 }
0x116b   : > { %4626 = vmatpush3.bf16.msra.mxu1 %v4782_v21  ;;  %4641 = vmatprep.subr.bf16.mxu0 %v4798_v24 }
0x116c   : > { %4649 = vmatprep.subr.bf16.mxu1 %v4798_v24 }
0x116e   : > { %4642 = vmatpush3.bf16.msra.mxu0 %v4784_v23 }
0x116f   : > { %4643 = vmatprep.subr.bf16.mxu0 %v4798_v24 }
0x1172   : > { %4644 = vmatpush3.bf16.msra.mxu0 %v4785_v25 }
0x1228   : > { %v3066_v26 = vpop.f32.mrb[88].mxu1 }
0x1229   : > { %v3072_v27 = vadd.f32 %v3066_v26, %v2949_v1  ;;  %v4593_v28 = vpop.f32.mrb[89].mxu1  ;;  %v3565_v1 = vld [vmem:[%s5600_s8] sm:$0x1] }
0x122a   : > { %v3069_v29 = vpop.f32.mrb[90].mxu1 }
0x122b   : > { %v4594_v30 = vpop.f32.mrb[91].mxu1 }
0x1230   : > { %v3189_v31 = vpop.f32.mrb[96].mxu0  ;;  %v3235_v32 = vpop.f32.mrb[92].mxu1 }
0x1231   : > { %v3195_v38 = vadd.f32 %v3189_v31, %v3072_v27  ;;  %v3241_v49 = vpack.c.bf16 %v3235_v32, %v3235_v32  ;;  %v4617_v60 = vpop.f32.mrb[93].mxu1  ;;  %v4611_v5 = vpop.f32.mrb[97].mxu0 }
0x1232   : > { %v3238_v33 = vpop.f32.mrb[94].mxu1  ;;  %v3192_v34 = vpop.f32.mrb[98].mxu0 }
0x1233   : > { %4628 = vmatmul.mubr.msk.bf16.vlgmr.msra.gmra.mrb[96].mxu1 %vm597_vm1, %v3241_v49  ;;  %v4618_v35 = vpop.f32.mrb[95].mxu1  ;;  %v4612_v36 = vpop.f32.mrb[99].mxu0 }
0x1234   : > { %4650 = vmatpush3.bf16.msra.mxu1 %v5343_v59  ;;  %4651 = vmatprep.mubr.msk.bf16.mxu1 %vm4799_vm0, %v4798_v24 }
0x1235   : > { %4655 = vmatprep.subr.bf16.mxu1 %v4798_v24 }
0x1238   : > { %v3358_v37 = vpop.f32.mrb[100].mxu0 }
0x1239   : > { %v3364_v41 = vpack.c.bf16 %v3358_v37, %v3358_v37  ;;  %v4635_v42 = vpop.f32.mrb[101].mxu0 }
0x123a   : > { %v3361_v43 = vpop.f32.mrb[102].mxu0 }
0x123b   : > { %4646 = vmatmul.mubr.msk.bf16.vlgmr.msra.gmra.mrb[104].mxu0 %vm597_vm1, %v3364_v41  ;;  %4652 = vmatmul.mubr.msk.bf16.vlgmr.msra.gmra.mrb[100].mxu1 %vm2455_vm5, %v3936_v39  ;;  %v4636_v59 = vpop.f32.mrb[103].mxu0 }
0x123c   : > { %4656 = vmatpush3.bf16.msra.mxu1 %v4786_v40  ;;  %4663 = vmatprep.mubr.msk.bf16.mxu1 %vm4799_vm0, %v4798_v24 }
0x123d   : > { %4657 = vmatprep.subr.bf16.mxu1 %v4798_v24 }
0x1240   : > { %4658 = vmatpush3.bf16.msra.mxu1 %v4787_v44 }
0x1241   : > { %4659 = vmatprep.subr.bf16.mxu1 %v4798_v24 }
0x1244   : > { %4660 = vmatpush3.bf16.msra.mxu1 %v4788_v45 }
0x1245   : > { %4661 = vmatprep.subr.bf16.mxu1 %v4798_v24 }
0x1248   : > { %4662 = vmatpush3.bf16.msra.mxu1 %v4789_v46 }
0x1306   : > { %v3312_v47 = vpop.f32.mrb[96].mxu1 }
0x1307   : > { %v3318_v48 = vadd.f32 %v3312_v47, %v3195_v38  ;;  %v4629_v50 = vpop.f32.mrb[97].mxu1 }
0x1308   : > { %v3315_v51 = vpop.f32.mrb[98].mxu1 }
0x1309   : > { %v4630_v52 = vpop.f32.mrb[99].mxu1 }
0x130e   : > { %v3435_v53 = vpop.f32.mrb[104].mxu0  ;;  %v3481_v54 = vpop.f32.mrb[100].mxu1 }
0x130f   : > { %v3441_v55 = vadd.f32 %v3435_v53, %v3318_v48  ;;  %v3487_v56 = vpack.c.bf16 %v3481_v54, %v3481_v54  ;;  %v4653_v57 = vpop.f32.mrb[101].mxu1  ;;  %v4647_v58 = vpop.f32.mrb[105].mxu0 }
0x1310   : > { %v3484_v61 = vpop.f32.mrb[102].mxu1  ;;  %v3438_v62 = vpop.f32.mrb[106].mxu0 }
0x1311   : > { %4664 = vmatmul.mubr.msk.bf16.vlgmr.msra.gmra.mrb[104].mxu1 %vm597_vm1, %v3487_v56  ;;  %v4654_v24 = vpop.f32.mrb[103].mxu1  ;;  %v4648_v63 = vpop.f32.mrb[107].mxu0 }
0x13e4   : > { %v3558_v0 = vpop.f32.mrb[104].mxu1 }
0x13e5   : > { %v3564_v2 = vadd.f32 %v3558_v0, %v3441_v55  ;;  %v4665_v3 = vpop.f32.mrb[105].mxu1 }
0x13e6   : > { %v3561_v4 = vpop.f32.mrb[106].mxu1 }
0x13e7   : > { %v3566_v6 = vadd.f32 %v3565_v1, %v3564_v2  ;;  %v4666_v7 = vpop.f32.mrb[107].mxu1 }
0x13e9   : > { %v3567_v8 = vmax.f32 %v3566_v6, 0.0 }
0x13eb   : > { %v3568_v10 = vpack.c.bf16 %v3567_v8, %v3567_v8 }
0x13ed   : > { %v3573_v11 = vsel %vm3571_vm8, %v3568_v10, %v3572_v9 }
0x13ee   : > { %3574 = vst [vmem:[%s328_s13] sm:$0x1] %v3573_v11 }
0x13ef PF: > { %s19_s30 = sadd.s32 1, %s4796_s30  }
0x13f0   : > { %p16_p4 = scmp.ge.s32.totalorder %s19_s30, 4  }
0x13f2   :  { %18 = sbr.rel (!%p16_p4) target bundleno = 1 (0x1), region = 132 }

</bundles_post_ra>
